<compile_context>
chip_gen: v7x
topology: tpu7x:2x2x1
jax: 0.10.0
libtpu: 0.0.40
codegen_flags: <defaults>
</compile_context>

<pallas_src>
import functools

import numpy as np

import jax
import jax.numpy as jnp
from jax import lax
from jax.experimental import pallas as pl
from jax.experimental.pallas import tpu as pltpu

KSIZE = 7
PAD = 3
_LANES = 128
_SUBLANES = 8


def _round_up(x, m):
    return ((x + m - 1) // m) * m


# --------------------------------------------------------------------------- #
# In-kernel helpers
# --------------------------------------------------------------------------- #

def _reduce_channels(x_ref, c_block, HW):
    """Channel sum / max over x_ref[0] (shape (c_block, HW)).

    Streams aligned 8-channel (one sublane tile) chunks through a fori_loop so
    no large value is ever live.  Returns ((1, HW) f32 sum, (1, HW) f32 max).
    """

    def chunk(start, size):
        blk = x_ref[0, pl.ds(start, size), :]
        csum = jnp.sum(blk.astype(jnp.float32), axis=0, keepdims=True)
        cmax = jnp.max(blk, axis=0, keepdims=True)   # native dtype (bf16 stays bf16)
        return csum, cmax

    ch = _SUBLANES
    nfull = c_block // ch
    rem = c_block - nfull * ch

    if nfull == 0:
        s, m = chunk(0, rem)
        return s, m.astype(jnp.float32)

    s, m = chunk(0, ch)

    if nfull > 1:
        def body(i, carry):
            cs, cm = carry
            start = pl.multiple_of(i * ch, ch)       # aligned sublane-tile loads
            bs, bm = chunk(start, ch)
            return cs + bs, jnp.maximum(cm, bm)

        s, m = lax.fori_loop(1, nfull, body, (s, m), unroll=min(8, nfull - 1))

    if rem:
        bs, bm = chunk(nfull * ch, rem)
        s = s + bs
        m = jnp.maximum(m, bm)

    return s, m.astype(jnp.float32)


def _write_planes(flat_ref, s, m, *, HW, PADL):
    """Zero the flat halo and store the sum/max planes into the interior."""
    flat_ref[:, 0:PADL] = jnp.zeros((2, PADL), jnp.float32)
    flat_ref[:, PADL + HW:PADL + HW + PADL] = jnp.zeros((2, PADL), jnp.float32)
    flat_ref[0:1, pl.ds(PADL, HW)] = s       # channel *sum*; 1/C folded into weights
    flat_ref[1:2, pl.ds(PADL, HW)] = m


def _conv7x7_sigmoid_flat(w_ref, mask_ref, flat_ref, *, W, HW, PADL):
    """7x7 'same' conv over the two planes in flat_ref, then sigmoid.

    w_ref    : (98,) f32 SMEM scalars (avg-plane weights already scaled by 1/C)
    mask_ref : (7, HW) f32 {0,1} column-validity masks (one per kernel column)
    flat_ref : (2, HW + 2*PADL) f32 zero-haloed flat planes [sum, max]
    Returns the (1, HW) f32 sigmoid(conv) result.
    """
    # Hoist all 98 scalar weight loads out of the MAC loop.
    w_avg = [[w_ref[ki * KSIZE + kj] for kj in range(KSIZE)] for ki in range(KSIZE)]
    w_max = [[w_ref[KSIZE * KSIZE + ki * KSIZE + kj] for kj in range(KSIZE)]
             for ki in range(KSIZE)]

    acc = jnp.zeros((1, HW), jnp.float32)
    for kj in range(KSIZE):                  # kj outer: one column mask live at a time
        dc = kj - PAD
        cmask = mask_ref[kj:kj + 1, :]       # (1, HW)
        for ki in range(KSIZE):
            dr = ki - PAD
            off = PADL + dr * W + dc         # static lane offset into the padded row
            sa = flat_ref[0:1, pl.ds(off, HW)]
            sm = flat_ref[1:2, pl.ds(off, HW)]
            tap = w_avg[ki][kj] * sa + w_max[ki][kj] * sm
            acc = acc + tap * cmask
    return jax.nn.sigmoid(acc)


# --------------------------------------------------------------------------- #
# Kernels
# --------------------------------------------------------------------------- #

def _sa_kernel_single(w_ref, mask_ref, x_ref, o_ref, flat_ref, *, C, W, HW, PADL):
    """n_c == 1 fast path: reduce + conv + sigmoid in one phase, no accumulators."""
    s, m = _reduce_channels(x_ref, C, HW)
    _write_planes(flat_ref, s, m, HW=HW, PADL=PADL)
    y = _conv7x7_sigmoid_flat(w_ref, mask_ref, flat_ref, W=W, HW=HW, PADL=PADL)
    o_ref[0] = y.astype(o_ref.dtype)


def _sa_kernel_chunked(w_ref, mask_ref, x_ref, o_ref, flat_ref, *, c_block, W, HW, PADL):
    """Streamed channel reduction (grid axis 1, 'arbitrary') for very large C*H*W."""
    c_idx = pl.program_id(1)
    n_c = pl.num_programs(1)

    s, m = _reduce_channels(x_ref, c_block, HW)

    @pl.when(c_idx == 0)
    def _():
        # Fully (re)initialised for every batch element -> no stale per-core scratch.
        _write_planes(flat_ref, s, m, HW=HW, PADL=PADL)

    @pl.when(c_idx > 0)
    def _():
        flat_ref[0:1, pl.ds(PADL, HW)] = flat_ref[0:1, pl.ds(PADL, HW)] + s
        flat_ref[1:2, pl.ds(PADL, HW)] = jnp.maximum(flat_ref[1:2, pl.ds(PADL, HW)], m)

    @pl.when(c_idx == n_c - 1)
    def _():
        y = _conv7x7_sigmoid_flat(w_ref, mask_ref, flat_ref, W=W, HW=HW, PADL=PADL)
        o_ref[0] = y.astype(o_ref.dtype)


# --------------------------------------------------------------------------- #
# Wrapper
# --------------------------------------------------------------------------- #

def _vmem_budget():
    """(vmem_limit_bytes, per-input-tile byte cap) chosen per TPU generation."""
    cap = None
    try:
        cap = getattr(pltpu.get_tpu_info(), "vmem_capacity_bytes", None)
    except Exception:
        cap = None
    if cap is None:
        cap = 64 * 1024 * 1024                        # assume the smallest (v7x)
    if cap >= 128 * 1024 * 1024:                      # v5e / v6e: 128 MiB physical
        return 96 * 1024 * 1024, 24 * 1024 * 1024
    return 32 * 1024 * 1024, 10 * 1024 * 1024         # v7x (64 MiB) or unknown


def _pick_c_block(C, HW, itemsize, tile_cap_bytes):
    """All of C if it fits the tile budget (common case); otherwise the largest
    divisor of C that is a multiple of 8 (sublane tiling) and fits."""
    if C * HW * itemsize <= tile_cap_bytes:
        return C
    for d in range(C - 1, 0, -1):
        if C % d == 0 and d % _SUBLANES == 0 and d * HW * itemsize <= tile_cap_bytes:
            return d
    return C   # no clean divisor: fall back to the whole channel stack


def spatial_attention(x, conv_weight, *, c_block=None):
    """x: (B, C, H, W), conv_weight: (1, 2, 7, 7)  ->  sigmoid(conv): (B, 1, H, W)."""
    B, C, H, W = x.shape
    assert conv_weight.shape == (1, 2, KSIZE, KSIZE)
    HW = H * W
    PADL = _round_up(PAD * W + PAD, _LANES)   # lane-aligned flat halo width

    # Fold the 1/C of the channel mean into the avg-plane weights (free).
    w_eff = conv_weight.astype(jnp.float32)
    w_eff = w_eff.at[0, 0].multiply(1.0 / C)
    w_flat = w_eff.reshape(-1)                # (98,) scalars -> SMEM

    # Host-precomputed column-validity masks (one per kernel column).
    cols = np.arange(HW) % W
    col_mask = np.stack(
        [((cols + (kj - PAD) >= 0) & (cols + (kj - PAD) < W)).astype(np.float32)
         for kj in range(KSIZE)])
    col_mask = jnp.asarray(col_mask)          # (7, HW)

    vmem_limit, tile_cap = _vmem_budget()
    itemsize = jnp.dtype(x.dtype).itemsize
    if c_block is None:
        c_block = _pick_c_block(C, HW, itemsize, tile_cap)
    assert C % c_block == 0, "c_block must divide C"
    n_c = C // c_block

    x_flat = x.reshape(B, C, HW)              # free metadata reshape: lane-dense blocks

    scratch = [pltpu.VMEM((2, HW + 2 * PADL), jnp.float32)]
    smem_spec = pl.BlockSpec(memory_space=pltpu.MemorySpace.SMEM)

    if n_c == 1:
        kernel = functools.partial(_sa_kernel_single, C=C, W=W, HW=HW, PADL=PADL)
        grid = (B,)
        in_specs = [
            smem_spec,
            pl.BlockSpec((KSIZE, HW), lambda b: (0, 0)),
            pl.BlockSpec((1, C, HW), lambda b: (b, 0, 0)),
        ]
        out_specs = pl.BlockSpec((1, 1, HW), lambda b: (b, 0, 0))
        dim_sem = ("parallel",)
    else:
        kernel = functools.partial(_sa_kernel_chunked, c_block=c_block,
                                   W=W, HW=HW, PADL=PADL)
        grid = (B, n_c)                       # channel reduction innermost
        in_specs = [
            smem_spec,
            pl.BlockSpec((KSIZE, HW), lambda b, c: (0, 0)),
            pl.BlockSpec((1, c_block, HW), lambda b, c: (b, c, 0)),
        ]
        out_specs = pl.BlockSpec((1, 1, HW), lambda b, c: (b, 0, 0))
        dim_sem = ("parallel", "arbitrary")

    # TODO(synk): for B == 1 on dual-TensorCore parts (v7x) a second spatially
    # split 'parallel' axis (with a +/-3-row conv halo) would keep both cores busy.

    out_flat = pl.pallas_call(
        kernel,
        out_shape=jax.ShapeDtypeStruct((B, 1, HW), x.dtype),
        grid=grid,
        in_specs=in_specs,
        out_specs=out_specs,
        scratch_shapes=scratch,
        compiler_params=pltpu.CompilerParams(
            dimension_semantics=dim_sem,
            vmem_limit_bytes=vmem_limit,
        ),
    )(w_flat, col_mask, x_flat)

    return out_flat.reshape(B, 1, H, W)


# --------------------------------------------------------------------------- #
# Reference + self-test
# --------------------------------------------------------------------------- #

def _reference(x, conv_weight):
    avg = jnp.mean(x, axis=1, keepdims=True)
    mx = jnp.max(x, axis=1, keepdims=True)
    cat = jnp.concatenate([avg, mx], axis=1)
    y = lax.conv_general_dilated(
        cat, conv_weight, window_strides=(1, 1),
        padding=[(PAD, PAD), (PAD, PAD)],
        dimension_numbers=("NCHW", "OIHW", "NCHW"))
    return jax.nn.sigmoid(y)


if __name__ == "__main__":
    key = jax.random.PRNGKey(0)
    kx, kw, kx2 = jax.random.split(key, 3)

    # Shapes implied by the module: NCHW input, 2->1 channel 7x7 conv.
    B, C, H, W = 2, 4, 16, 16
    x = jax.random.normal(kx, (B, C, H, W), dtype=jnp.float32)
    conv_weight = 0.05 * jax.random.normal(kw, (1, 2, KSIZE, KSIZE), dtype=jnp.float32)

    out = jax.block_until_ready(spatial_attention(x, conv_weight))
    ref = _reference(x, conv_weight)
    assert out.shape == (B, 1, H, W)
    assert jnp.allclose(out, ref, atol=2e-5, rtol=2e-5), "single-pass kernel mismatch"

    # Validate the fori_loop reduction and the multi-chunk accumulation branch
    # (the review's flagged untested path) with a larger channel count.
    C2 = 64
    x2 = jax.random.normal(kx2, (B, C2, H, W), dtype=jnp.float32)
    ref2 = _reference(x2, conv_weight)
    out2 = jax.block_until_ready(spatial_attention(x2, conv_weight))               # single pass
    out3 = jax.block_until_ready(spatial_attention(x2, conv_weight, c_block=16))   # chunked path
    assert jnp.allclose(out2, ref2, atol=2e-5, rtol=2e-5), "fori_loop reduction mismatch"
    assert jnp.allclose(out3, ref2, atol=2e-5, rtol=2e-5), "chunked accumulation mismatch"

    print("KERNEL_OK")
</pallas_src>

<mosaic_0001>
module attributes {stable_mosaic.version = 11 : i64} {
  func.func @_sa_kernel_single(%arg0: i32, %arg1: memref<98xf32, #tpu.memory_space<smem>>, %arg2: memref<7x256xf32, #tpu.memory_space<vmem>>, %arg3: memref<1x4x256xf32, #tpu.memory_space<vmem>>, %arg4: memref<1x1x256xf32, #tpu.memory_space<vmem>>, %arg5: memref<2x512xf32, #tpu.memory_space<vmem>>) attributes {dimension_semantics = [#tpu.dimension_semantics<parallel>], iteration_bounds = array<i64: 2>, scalar_prefetch = 0 : i64, scratch_operands = 1 : i64, tpu.core_type = #tpu.core_type<tc>, window_params = [{transform_indices = @transform_0, window_bounds = array<i64: 98>}, {pipeline_mode = #tpu.pipeline_mode<synchronous>, transform_indices = @transform_1, window_bounds = array<i64: 7, 256>}, {transform_indices = @transform_2, window_bounds = array<i64: 1, 4, 256>}, {transform_indices = @transform_3, window_bounds = array<i64: 1, 1, 256>}]} {
    %c0 = arith.constant 0 : index
    %c0_0 = arith.constant 0 : index
    %c0_1 = arith.constant 0 : index
    %0 = vector.load %arg3[%c0, %c0_0, %c0_1] : memref<1x4x256xf32, #tpu.memory_space<vmem>>, vector<1x4x256xf32>
    %1 = vector.shape_cast %0 : vector<1x4x256xf32> to vector<4x256xf32>
    %cst = arith.constant dense<0.000000e+00> : vector<256xf32>
    %2 = vector.multi_reduction <add>, %1, %cst [0] : vector<4x256xf32> to vector<256xf32>
    %3 = vector.shape_cast %2 : vector<256xf32> to vector<1x256xf32>
    %cst_2 = arith.constant dense<0xFF800000> : vector<256xf32>
    %4 = vector.multi_reduction <maximumf>, %1, %cst_2 [0] : vector<4x256xf32> to vector<256xf32>
    %5 = vector.shape_cast %4 : vector<256xf32> to vector<1x256xf32>
    %cst_3 = arith.constant 0.000000e+00 : f32
    %6 = vector.broadcast %cst_3 : f32 to vector<2x128xf32>
    %c0_4 = arith.constant 0 : index
    %c0_5 = arith.constant 0 : index
    %7 = vector.load %arg5[%c0_4, %c0_5] : memref<2x512xf32, #tpu.memory_space<vmem>>, vector<2x128xf32>
    tpu.vector_store %arg5[%c0_4, %c0_5], %6 {strides = array<i32>} : memref<2x512xf32, #tpu.memory_space<vmem>>, vector<2x128xf32>,
    %cst_6 = arith.constant 0.000000e+00 : f32
    %8 = vector.broadcast %cst_6 : f32 to vector<2x128xf32>
    %c0_7 = arith.constant 0 : index
    %c384 = arith.constant 384 : index
    %9 = vector.load %arg5[%c0_7, %c384] : memref<2x512xf32, #tpu.memory_space<vmem>>, vector<2x128xf32>
    tpu.vector_store %arg5[%c0_7, %c384], %8 {strides = array<i32>} : memref<2x512xf32, #tpu.memory_space<vmem>>, vector<2x128xf32>,
    %c0_8 = arith.constant 0 : index
    %c128 = arith.constant 128 : index
    %10 = vector.load %arg5[%c0_8, %c128] : memref<2x512xf32, #tpu.memory_space<vmem>>, vector<1x256xf32>
    tpu.vector_store %arg5[%c0_8, %c128], %3 {strides = array<i32>} : memref<2x512xf32, #tpu.memory_space<vmem>>, vector<1x256xf32>,
    %c1 = arith.constant 1 : index
    %c128_9 = arith.constant 128 : index
    %11 = vector.load %arg5[%c1, %c128_9] : memref<2x512xf32, #tpu.memory_space<vmem>>, vector<1x256xf32>
    tpu.vector_store %arg5[%c1, %c128_9], %5 {strides = array<i32>} : memref<2x512xf32, #tpu.memory_space<vmem>>, vector<1x256xf32>,
    %c0_10 = arith.constant 0 : index
    %12 = memref.load %arg1[%c0_10] : memref<98xf32, #tpu.memory_space<smem>>
    %c1_11 = arith.constant 1 : index
    %13 = memref.load %arg1[%c1_11] : memref<98xf32, #tpu.memory_space<smem>>
    %c2 = arith.constant 2 : index
    %14 = memref.load %arg1[%c2] : memref<98xf32, #tpu.memory_space<smem>>
    %c3 = arith.constant 3 : index
    %15 = memref.load %arg1[%c3] : memref<98xf32, #tpu.memory_space<smem>>
    %c4 = arith.constant 4 : index
    %16 = memref.load %arg1[%c4] : memref<98xf32, #tpu.memory_space<smem>>
    %c5 = arith.constant 5 : index
    %17 = memref.load %arg1[%c5] : memref<98xf32, #tpu.memory_space<smem>>
    %c6 = arith.constant 6 : index
    %18 = memref.load %arg1[%c6] : memref<98xf32, #tpu.memory_space<smem>>
    %c7 = arith.constant 7 : index
    %19 = memref.load %arg1[%c7] : memref<98xf32, #tpu.memory_space<smem>>
    %c8 = arith.constant 8 : index
    %20 = memref.load %arg1[%c8] : memref<98xf32, #tpu.memory_space<smem>>
    %c9 = arith.constant 9 : index
    %21 = memref.load %arg1[%c9] : memref<98xf32, #tpu.memory_space<smem>>
    %c10 = arith.constant 10 : index
    %22 = memref.load %arg1[%c10] : memref<98xf32, #tpu.memory_space<smem>>
    %c11 = arith.constant 11 : index
    %23 = memref.load %arg1[%c11] : memref<98xf32, #tpu.memory_space<smem>>
    %c12 = arith.constant 12 : index
    %24 = memref.load %arg1[%c12] : memref<98xf32, #tpu.memory_space<smem>>
    %c13 = arith.constant 13 : index
    %25 = memref.load %arg1[%c13] : memref<98xf32, #tpu.memory_space<smem>>
    %c14 = arith.constant 14 : index
    %26 = memref.load %arg1[%c14] : memref<98xf32, #tpu.memory_space<smem>>
    %c15 = arith.constant 15 : index
    %27 = memref.load %arg1[%c15] : memref<98xf32, #tpu.memory_space<smem>>
    %c16 = arith.constant 16 : index
    %28 = memref.load %arg1[%c16] : memref<98xf32, #tpu.memory_space<smem>>
    %c17 = arith.constant 17 : index
    %29 = memref.load %arg1[%c17] : memref<98xf32, #tpu.memory_space<smem>>
    %c18 = arith.constant 18 : index
    %30 = memref.load %arg1[%c18] : memref<98xf32, #tpu.memory_space<smem>>
    %c19 = arith.constant 19 : index
    %31 = memref.load %arg1[%c19] : memref<98xf32, #tpu.memory_space<smem>>
    %c20 = arith.constant 20 : index
    %32 = memref.load %arg1[%c20] : memref<98xf32, #tpu.memory_space<smem>>
    %c21 = arith.constant 21 : index
    %33 = memref.load %arg1[%c21] : memref<98xf32, #tpu.memory_space<smem>>
    %c22 = arith.constant 22 : index
    %34 = memref.load %arg1[%c22] : memref<98xf32, #tpu.memory_space<smem>>
    %c23 = arith.constant 23 : index
    %35 = memref.load %arg1[%c23] : memref<98xf32, #tpu.memory_space<smem>>
    %c24 = arith.constant 24 : index
    %36 = memref.load %arg1[%c24] : memref<98xf32, #tpu.memory_space<smem>>
    %c25 = arith.constant 25 : index
    %37 = memref.load %arg1[%c25] : memref<98xf32, #tpu.memory_space<smem>>
    %c26 = arith.constant 26 : index
    %38 = memref.load %arg1[%c26] : memref<98xf32, #tpu.memory_space<smem>>
    %c27 = arith.constant 27 : index
    %39 = memref.load %arg1[%c27] : memref<98xf32, #tpu.memory_space<smem>>
    %c28 = arith.constant 28 : index
    %40 = memref.load %arg1[%c28] : memref<98xf32, #tpu.memory_space<smem>>
    %c29 = arith.constant 29 : index
    %41 = memref.load %arg1[%c29] : memref<98xf32, #tpu.memory_space<smem>>
    %c30 = arith.constant 30 : index
    %42 = memref.load %arg1[%c30] : memref<98xf32, #tpu.memory_space<smem>>
    %c31 = arith.constant 31 : index
    %43 = memref.load %arg1[%c31] : memref<98xf32, #tpu.memory_space<smem>>
    %c32 = arith.constant 32 : index
    %44 = memref.load %arg1[%c32] : memref<98xf32, #tpu.memory_space<smem>>
    %c33 = arith.constant 33 : index
    %45 = memref.load %arg1[%c33] : memref<98xf32, #tpu.memory_space<smem>>
    %c34 = arith.constant 34 : index
    %46 = memref.load %arg1[%c34] : memref<98xf32, #tpu.memory_space<smem>>
    %c35 = arith.constant 35 : index
    %47 = memref.load %arg1[%c35] : memref<98xf32, #tpu.memory_space<smem>>
    %c36 = arith.constant 36 : index
    %48 = memref.load %arg1[%c36] : memref<98xf32, #tpu.memory_space<smem>>
    %c37 = arith.constant 37 : index
    %49 = memref.load %arg1[%c37] : memref<98xf32, #tpu.memory_space<smem>>
    %c38 = arith.constant 38 : index
    %50 = memref.load %arg1[%c38] : memref<98xf32, #tpu.memory_space<smem>>
    %c39 = arith.constant 39 : index
    %51 = memref.load %arg1[%c39] : memref<98xf32, #tpu.memory_space<smem>>
    %c40 = arith.constant 40 : index
    %52 = memref.load %arg1[%c40] : memref<98xf32, #tpu.memory_space<smem>>
    %c41 = arith.constant 41 : index
    %53 = memref.load %arg1[%c41] : memref<98xf32, #tpu.memory_space<smem>>
    %c42 = arith.constant 42 : index
    %54 = memref.load %arg1[%c42] : memref<98xf32, #tpu.memory_space<smem>>
    %c43 = arith.constant 43 : index
    %55 = memref.load %arg1[%c43] : memref<98xf32, #tpu.memory_space<smem>>
    %c44 = arith.constant 44 : index
    %56 = memref.load %arg1[%c44] : memref<98xf32, #tpu.memory_space<smem>>
    %c45 = arith.constant 45 : index
    %57 = memref.load %arg1[%c45] : memref<98xf32, #tpu.memory_space<smem>>
    %c46 = arith.constant 46 : index
    %58 = memref.load %arg1[%c46] : memref<98xf32, #tpu.memory_space<smem>>
    %c47 = arith.constant 47 : index
    %59 = memref.load %arg1[%c47] : memref<98xf32, #tpu.memory_space<smem>>
    %c48 = arith.constant 48 : index
    %60 = memref.load %arg1[%c48] : memref<98xf32, #tpu.memory_space<smem>>
    %c49 = arith.constant 49 : index
    %61 = memref.load %arg1[%c49] : memref<98xf32, #tpu.memory_space<smem>>
    %c50 = arith.constant 50 : index
    %62 = memref.load %arg1[%c50] : memref<98xf32, #tpu.memory_space<smem>>
    %c51 = arith.constant 51 : index
    %63 = memref.load %arg1[%c51] : memref<98xf32, #tpu.memory_space<smem>>
    %c52 = arith.constant 52 : index
    %64 = memref.load %arg1[%c52] : memref<98xf32, #tpu.memory_space<smem>>
    %c53 = arith.constant 53 : index
    %65 = memref.load %arg1[%c53] : memref<98xf32, #tpu.memory_space<smem>>
    %c54 = arith.constant 54 : index
    %66 = memref.load %arg1[%c54] : memref<98xf32, #tpu.memory_space<smem>>
    %c55 = arith.constant 55 : index
    %67 = memref.load %arg1[%c55] : memref<98xf32, #tpu.memory_space<smem>>
    %c56 = arith.constant 56 : index
    %68 = memref.load %arg1[%c56] : memref<98xf32, #tpu.memory_space<smem>>
    %c57 = arith.constant 57 : index
    %69 = memref.load %arg1[%c57] : memref<98xf32, #tpu.memory_space<smem>>
    %c58 = arith.constant 58 : index
    %70 = memref.load %arg1[%c58] : memref<98xf32, #tpu.memory_space<smem>>
    %c59 = arith.constant 59 : index
    %71 = memref.load %arg1[%c59] : memref<98xf32, #tpu.memory_space<smem>>
    %c60 = arith.constant 60 : index
    %72 = memref.load %arg1[%c60] : memref<98xf32, #tpu.memory_space<smem>>
    %c61 = arith.constant 61 : index
    %73 = memref.load %arg1[%c61] : memref<98xf32, #tpu.memory_space<smem>>
    %c62 = arith.constant 62 : index
    %74 = memref.load %arg1[%c62] : memref<98xf32, #tpu.memory_space<smem>>
    %c63 = arith.constant 63 : index
    %75 = memref.load %arg1[%c63] : memref<98xf32, #tpu.memory_space<smem>>
    %c64 = arith.constant 64 : index
    %76 = memref.load %arg1[%c64] : memref<98xf32, #tpu.memory_space<smem>>
    %c65 = arith.constant 65 : index
    %77 = memref.load %arg1[%c65] : memref<98xf32, #tpu.memory_space<smem>>
    %c66 = arith.constant 66 : index
    %78 = memref.load %arg1[%c66] : memref<98xf32, #tpu.memory_space<smem>>
    %c67 = arith.constant 67 : index
    %79 = memref.load %arg1[%c67] : memref<98xf32, #tpu.memory_space<smem>>
    %c68 = arith.constant 68 : index
    %80 = memref.load %arg1[%c68] : memref<98xf32, #tpu.memory_space<smem>>
    %c69 = arith.constant 69 : index
    %81 = memref.load %arg1[%c69] : memref<98xf32, #tpu.memory_space<smem>>
    %c70 = arith.constant 70 : index
    %82 = memref.load %arg1[%c70] : memref<98xf32, #tpu.memory_space<smem>>
    %c71 = arith.constant 71 : index
    %83 = memref.load %arg1[%c71] : memref<98xf32, #tpu.memory_space<smem>>
    %c72 = arith.constant 72 : index
    %84 = memref.load %arg1[%c72] : memref<98xf32, #tpu.memory_space<smem>>
    %c73 = arith.constant 73 : index
    %85 = memref.load %arg1[%c73] : memref<98xf32, #tpu.memory_space<smem>>
    %c74 = arith.constant 74 : index
    %86 = memref.load %arg1[%c74] : memref<98xf32, #tpu.memory_space<smem>>
    %c75 = arith.constant 75 : index
    %87 = memref.load %arg1[%c75] : memref<98xf32, #tpu.memory_space<smem>>
    %c76 = arith.constant 76 : index
    %88 = memref.load %arg1[%c76] : memref<98xf32, #tpu.memory_space<smem>>
    %c77 = arith.constant 77 : index
    %89 = memref.load %arg1[%c77] : memref<98xf32, #tpu.memory_space<smem>>
    %c78 = arith.constant 78 : index
    %90 = memref.load %arg1[%c78] : memref<98xf32, #tpu.memory_space<smem>>
    %c79 = arith.constant 79 : index
    %91 = memref.load %arg1[%c79] : memref<98xf32, #tpu.memory_space<smem>>
    %c80 = arith.constant 80 : index
    %92 = memref.load %arg1[%c80] : memref<98xf32, #tpu.memory_space<smem>>
    %c81 = arith.constant 81 : index
    %93 = memref.load %arg1[%c81] : memref<98xf32, #tpu.memory_space<smem>>
    %c82 = arith.constant 82 : index
    %94 = memref.load %arg1[%c82] : memref<98xf32, #tpu.memory_space<smem>>
    %c83 = arith.constant 83 : index
    %95 = memref.load %arg1[%c83] : memref<98xf32, #tpu.memory_space<smem>>
    %c84 = arith.constant 84 : index
    %96 = memref.load %arg1[%c84] : memref<98xf32, #tpu.memory_space<smem>>
    %c85 = arith.constant 85 : index
    %97 = memref.load %arg1[%c85] : memref<98xf32, #tpu.memory_space<smem>>
    %c86 = arith.constant 86 : index
    %98 = memref.load %arg1[%c86] : memref<98xf32, #tpu.memory_space<smem>>
    %c87 = arith.constant 87 : index
    %99 = memref.load %arg1[%c87] : memref<98xf32, #tpu.memory_space<smem>>
    %c88 = arith.constant 88 : index
    %100 = memref.load %arg1[%c88] : memref<98xf32, #tpu.memory_space<smem>>
    %c89 = arith.constant 89 : index
    %101 = memref.load %arg1[%c89] : memref<98xf32, #tpu.memory_space<smem>>
    %c90 = arith.constant 90 : index
    %102 = memref.load %arg1[%c90] : memref<98xf32, #tpu.memory_space<smem>>
    %c91 = arith.constant 91 : index
    %103 = memref.load %arg1[%c91] : memref<98xf32, #tpu.memory_space<smem>>
    %c92 = arith.constant 92 : index
    %104 = memref.load %arg1[%c92] : memref<98xf32, #tpu.memory_space<smem>>
    %c93 = arith.constant 93 : index
    %105 = memref.load %arg1[%c93] : memref<98xf32, #tpu.memory_space<smem>>
    %c94 = arith.constant 94 : index
    %106 = memref.load %arg1[%c94] : memref<98xf32, #tpu.memory_space<smem>>
    %c95 = arith.constant 95 : index
    %107 = memref.load %arg1[%c95] : memref<98xf32, #tpu.memory_space<smem>>
    %c96 = arith.constant 96 : index
    %108 = memref.load %arg1[%c96] : memref<98xf32, #tpu.memory_space<smem>>
    %c97 = arith.constant 97 : index
    %109 = memref.load %arg1[%c97] : memref<98xf32, #tpu.memory_space<smem>>
    %cst_12 = arith.constant 0.000000e+00 : f32
    %110 = vector.broadcast %cst_12 : f32 to vector<1x256xf32>
    %c0_13 = arith.constant 0 : index
    %c0_14 = arith.constant 0 : index
    %111 = vector.load %arg2[%c0_13, %c0_14] : memref<7x256xf32, #tpu.memory_space<vmem>>, vector<1x256xf32>
    %c0_15 = arith.constant 0 : index
    %c77_16 = arith.constant 77 : index
    %112 = vector.load %arg5[%c0_15, %c77_16] : memref<2x512xf32, #tpu.memory_space<vmem>>, vector<1x256xf32>
    %c1_17 = arith.constant 1 : index
    %c77_18 = arith.constant 77 : index
    %113 = vector.load %arg5[%c1_17, %c77_18] : memref<2x512xf32, #tpu.memory_space<vmem>>, vector<1x256xf32>
    %114 = vector.broadcast %12 : f32 to vector<1x256xf32>
    %115 = arith.mulf %114, %112 : vector<1x256xf32>
    %116 = vector.broadcast %61 : f32 to vector<1x256xf32>
    %117 = arith.mulf %116, %113 : vector<1x256xf32>
    %118 = arith.addf %115, %117 : vector<1x256xf32>
    %119 = arith.mulf %118, %111 : vector<1x256xf32>
    %120 = arith.addf %110, %119 : vector<1x256xf32>
    %c0_19 = arith.constant 0 : index
    %c93_20 = arith.constant 93 : index
    %121 = vector.load %arg5[%c0_19, %c93_20] : memref<2x512xf32, #tpu.memory_space<vmem>>, vector<1x256xf32>
    %c1_21 = arith.constant 1 : index
    %c93_22 = arith.constant 93 : index
    %122 = vector.load %arg5[%c1_21, %c93_22] : memref<2x512xf32, #tpu.memory_space<vmem>>, vector<1x256xf32>
    %123 = vector.broadcast %19 : f32 to vector<1x256xf32>
    %124 = arith.mulf %123, %121 : vector<1x256xf32>
    %125 = vector.broadcast %68 : f32 to vector<1x256xf32>
    %126 = arith.mulf %125, %122 : vector<1x256xf32>
    %127 = arith.addf %124, %126 : vector<1x256xf32>
    %128 = arith.mulf %127, %111 : vector<1x256xf32>
    %129 = arith.addf %120, %128 : vector<1x256xf32>
    %c0_23 = arith.constant 0 : index
    %c109 = arith.constant 109 : index
    %130 = vector.load %arg5[%c0_23, %c109] : memref<2x512xf32, #tpu.memory_space<vmem>>, vector<1x256xf32>
    %c1_24 = arith.constant 1 : index
    %c109_25 = arith.constant 109 : index
    %131 = vector.load %arg5[%c1_24, %c109_25] : memref<2x512xf32, #tpu.memory_space<vmem>>, vector<1x256xf32>
    %132 = vector.broadcast %26 : f32 to vector<1x256xf32>
    %133 = arith.mulf %132, %130 : vector<1x256xf32>
    %134 = vector.broadcast %75 : f32 to vector<1x256xf32>
    %135 = arith.mulf %134, %131 : vector<1x256xf32>
    %136 = arith.addf %133, %135 : vector<1x256xf32>
    %137 = arith.mulf %136, %111 : vector<1x256xf32>
    %138 = arith.addf %129, %137 : vector<1x256xf32>
    %c0_26 = arith.constant 0 : index
    %c125 = arith.constant 125 : index
    %139 = vector.load %arg5[%c0_26, %c125] : memref<2x512xf32, #tpu.memory_space<vmem>>, vector<1x256xf32>
    %c1_27 = arith.constant 1 : index
    %c125_28 = arith.constant 125 : index
    %140 = vector.load %arg5[%c1_27, %c125_28] : memref<2x512xf32, #tpu.memory_space<vmem>>, vector<1x256xf32>
    %141 = vector.broadcast %33 : f32 to vector<1x256xf32>
    %142 = arith.mulf %141, %139 : vector<1x256xf32>
    %143 = vector.broadcast %82 : f32 to vector<1x256xf32>
    %144 = arith.mulf %143, %140 : vector<1x256xf32>
    %145 = arith.addf %142, %144 : vector<1x256xf32>
    %146 = arith.mulf %145, %111 : vector<1x256xf32>
    %147 = arith.addf %138, %146 : vector<1x256xf32>
    %c0_29 = arith.constant 0 : index
    %c141 = arith.constant 141 : index
    %148 = vector.load %arg5[%c0_29, %c141] : memref<2x512xf32, #tpu.memory_space<vmem>>, vector<1x256xf32>
    %c1_30 = arith.constant 1 : index
    %c141_31 = arith.constant 141 : index
    %149 = vector.load %arg5[%c1_30, %c141_31] : memref<2x512xf32, #tpu.memory_space<vmem>>, vector<1x256xf32>
    %150 = vector.broadcast %40 : f32 to vector<1x256xf32>
    %151 = arith.mulf %150, %148 : vector<1x256xf32>
    %152 = vector.broadcast %89 : f32 to vector<1x256xf32>
    %153 = arith.mulf %152, %149 : vector<1x256xf32>
    %154 = arith.addf %151, %153 : vector<1x256xf32>
    %155 = arith.mulf %154, %111 : vector<1x256xf32>
    %156 = arith.addf %147, %155 : vector<1x256xf32>
    %c0_32 = arith.constant 0 : index
    %c157 = arith.constant 157 : index
    %157 = vector.load %arg5[%c0_32, %c157] : memref<2x512xf32, #tpu.memory_space<vmem>>, vector<1x256xf32>
    %c1_33 = arith.constant 1 : index
    %c157_34 = arith.constant 157 : index
    %158 = vector.load %arg5[%c1_33, %c157_34] : memref<2x512xf32, #tpu.memory_space<vmem>>, vector<1x256xf32>
    %159 = vector.broadcast %47 : f32 to vector<1x256xf32>
    %160 = arith.mulf %159, %157 : vector<1x256xf32>
    %161 = vector.broadcast %96 : f32 to vector<1x256xf32>
    %162 = arith.mulf %161, %158 : vector<1x256xf32>
    %163 = arith.addf %160, %162 : vector<1x256xf32>
    %164 = arith.mulf %163, %111 : vector<1x256xf32>
    %165 = arith.addf %156, %164 : vector<1x256xf32>
    %c0_35 = arith.constant 0 : index
    %c173 = arith.constant 173 : index
    %166 = vector.load %arg5[%c0_35, %c173] : memref<2x512xf32, #tpu.memory_space<vmem>>, vector<1x256xf32>
    %c1_36 = arith.constant 1 : index
    %c173_37 = arith.constant 173 : index
    %167 = vector.load %arg5[%c1_36, %c173_37] : memref<2x512xf32, #tpu.memory_space<vmem>>, vector<1x256xf32>
    %168 = vector.broadcast %54 : f32 to vector<1x256xf32>
    %169 = arith.mulf %168, %166 : vector<1x256xf32>
    %170 = vector.broadcast %103 : f32 to vector<1x256xf32>
    %171 = arith.mulf %170, %167 : vector<1x256xf32>
    %172 = arith.addf %169, %171 : vector<1x256xf32>
    %173 = arith.mulf %172, %111 : vector<1x256xf32>
    %174 = arith.addf %165, %173 : vector<1x256xf32>
    %c1_38 = arith.constant 1 : index
    %c0_39 = arith.constant 0 : index
    %175 = vector.load %arg2[%c1_38, %c0_39] : memref<7x256xf32, #tpu.memory_space<vmem>>, vector<1x256xf32>
    %c0_40 = arith.constant 0 : index
    %c78_41 = arith.constant 78 : index
    %176 = vector.load %arg5[%c0_40, %c78_41] : memref<2x512xf32, #tpu.memory_space<vmem>>, vector<1x256xf32>
    %c1_42 = arith.constant 1 : index
    %c78_43 = arith.constant 78 : index
    %177 = vector.load %arg5[%c1_42, %c78_43] : memref<2x512xf32, #tpu.memory_space<vmem>>, vector<1x256xf32>
    %178 = vector.broadcast %13 : f32 to vector<1x256xf32>
    %179 = arith.mulf %178, %176 : vector<1x256xf32>
    %180 = vector.broadcast %62 : f32 to vector<1x256xf32>
    %181 = arith.mulf %180, %177 : vector<1x256xf32>
    %182 = arith.addf %179, %181 : vector<1x256xf32>
    %183 = arith.mulf %182, %175 : vector<1x256xf32>
    %184 = arith.addf %174, %183 : vector<1x256xf32>
    %c0_44 = arith.constant 0 : index
    %c94_45 = arith.constant 94 : index
    %185 = vector.load %arg5[%c0_44, %c94_45] : memref<2x512xf32, #tpu.memory_space<vmem>>, vector<1x256xf32>
    %c1_46 = arith.constant 1 : index
    %c94_47 = arith.constant 94 : index
    %186 = vector.load %arg5[%c1_46, %c94_47] : memref<2x512xf32, #tpu.memory_space<vmem>>, vector<1x256xf32>
    %187 = vector.broadcast %20 : f32 to vector<1x256xf32>
    %188 = arith.mulf %187, %185 : vector<1x256xf32>
    %189 = vector.broadcast %69 : f32 to vector<1x256xf32>
    %190 = arith.mulf %189, %186 : vector<1x256xf32>
    %191 = arith.addf %188, %190 : vector<1x256xf32>
    %192 = arith.mulf %191, %175 : vector<1x256xf32>
    %193 = arith.addf %184, %192 : vector<1x256xf32>
    %c0_48 = arith.constant 0 : index
    %c110 = arith.constant 110 : index
    %194 = vector.load %arg5[%c0_48, %c110] : memref<2x512xf32, #tpu.memory_space<vmem>>, vector<1x256xf32>
    %c1_49 = arith.constant 1 : index
    %c110_50 = arith.constant 110 : index
    %195 = vector.load %arg5[%c1_49, %c110_50] : memref<2x512xf32, #tpu.memory_space<vmem>>, vector<1x256xf32>
    %196 = vector.broadcast %27 : f32 to vector<1x256xf32>
    %197 = arith.mulf %196, %194 : vector<1x256xf32>
    %198 = vector.broadcast %76 : f32 to vector<1x256xf32>
    %199 = arith.mulf %198, %195 : vector<1x256xf32>
    %200 = arith.addf %197, %199 : vector<1x256xf32>
    %201 = arith.mulf %200, %175 : vector<1x256xf32>
    %202 = arith.addf %193, %201 : vector<1x256xf32>
    %c0_51 = arith.constant 0 : index
    %c126 = arith.constant 126 : index
    %203 = vector.load %arg5[%c0_51, %c126] : memref<2x512xf32, #tpu.memory_space<vmem>>, vector<1x256xf32>
    %c1_52 = arith.constant 1 : index
    %c126_53 = arith.constant 126 : index
    %204 = vector.load %arg5[%c1_52, %c126_53] : memref<2x512xf32, #tpu.memory_space<vmem>>, vector<1x256xf32>
    %205 = vector.broadcast %34 : f32 to vector<1x256xf32>
    %206 = arith.mulf %205, %203 : vector<1x256xf32>
    %207 = vector.broadcast %83 : f32 to vector<1x256xf32>
    %208 = arith.mulf %207, %204 : vector<1x256xf32>
    %209 = arith.addf %206, %208 : vector<1x256xf32>
    %210 = arith.mulf %209, %175 : vector<1x256xf32>
    %211 = arith.addf %202, %210 : vector<1x256xf32>
    %c0_54 = arith.constant 0 : index
    %c142 = arith.constant 142 : index
    %212 = vector.load %arg5[%c0_54, %c142] : memref<2x512xf32, #tpu.memory_space<vmem>>, vector<1x256xf32>
    %c1_55 = arith.constant 1 : index
    %c142_56 = arith.constant 142 : index
    %213 = vector.load %arg5[%c1_55, %c142_56] : memref<2x512xf32, #tpu.memory_space<vmem>>, vector<1x256xf32>
    %214 = vector.broadcast %41 : f32 to vector<1x256xf32>
    %215 = arith.mulf %214, %212 : vector<1x256xf32>
    %216 = vector.broadcast %90 : f32 to vector<1x256xf32>
    %217 = arith.mulf %216, %213 : vector<1x256xf32>
    %218 = arith.addf %215, %217 : vector<1x256xf32>
    %219 = arith.mulf %218, %175 : vector<1x256xf32>
    %220 = arith.addf %211, %219 : vector<1x256xf32>
    %c0_57 = arith.constant 0 : index
    %c158 = arith.constant 158 : index
    %221 = vector.load %arg5[%c0_57, %c158] : memref<2x512xf32, #tpu.memory_space<vmem>>, vector<1x256xf32>
    %c1_58 = arith.constant 1 : index
    %c158_59 = arith.constant 158 : index
    %222 = vector.load %arg5[%c1_58, %c158_59] : memref<2x512xf32, #tpu.memory_space<vmem>>, vector<1x256xf32>
    %223 = vector.broadcast %48 : f32 to vector<1x256xf32>
    %224 = arith.mulf %223, %221 : vector<1x256xf32>
    %225 = vector.broadcast %97 : f32 to vector<1x256xf32>
    %226 = arith.mulf %225, %222 : vector<1x256xf32>
    %227 = arith.addf %224, %226 : vector<1x256xf32>
    %228 = arith.mulf %227, %175 : vector<1x256xf32>
    %229 = arith.addf %220, %228 : vector<1x256xf32>
    %c0_60 = arith.constant 0 : index
    %c174 = arith.constant 174 : index
    %230 = vector.load %arg5[%c0_60, %c174] : memref<2x512xf32, #tpu.memory_space<vmem>>, vector<1x256xf32>
    %c1_61 = arith.constant 1 : index
    %c174_62 = arith.constant 174 : index
    %231 = vector.load %arg5[%c1_61, %c174_62] : memref<2x512xf32, #tpu.memory_space<vmem>>, vector<1x256xf32>
    %232 = vector.broadcast %55 : f32 to vector<1x256xf32>
    %233 = arith.mulf %232, %230 : vector<1x256xf32>
    %234 = vector.broadcast %104 : f32 to vector<1x256xf32>
    %235 = arith.mulf %234, %231 : vector<1x256xf32>
    %236 = arith.addf %233, %235 : vector<1x256xf32>
    %237 = arith.mulf %236, %175 : vector<1x256xf32>
    %238 = arith.addf %229, %237 : vector<1x256xf32>
    %c2_63 = arith.constant 2 : index
    %c0_64 = arith.constant 0 : index
    %239 = vector.load %arg2[%c2_63, %c0_64] : memref<7x256xf32, #tpu.memory_space<vmem>>, vector<1x256xf32>
    %c0_65 = arith.constant 0 : index
    %c79_66 = arith.constant 79 : index
    %240 = vector.load %arg5[%c0_65, %c79_66] : memref<2x512xf32, #tpu.memory_space<vmem>>, vector<1x256xf32>
    %c1_67 = arith.constant 1 : index
    %c79_68 = arith.constant 79 : index
    %241 = vector.load %arg5[%c1_67, %c79_68] : memref<2x512xf32, #tpu.memory_space<vmem>>, vector<1x256xf32>
    %242 = vector.broadcast %14 : f32 to vector<1x256xf32>
    %243 = arith.mulf %242, %240 : vector<1x256xf32>
    %244 = vector.broadcast %63 : f32 to vector<1x256xf32>
    %245 = arith.mulf %244, %241 : vector<1x256xf32>
    %246 = arith.addf %243, %245 : vector<1x256xf32>
    %247 = arith.mulf %246, %239 : vector<1x256xf32>
    %248 = arith.addf %238, %247 : vector<1x256xf32>
    %c0_69 = arith.constant 0 : index
    %c95_70 = arith.constant 95 : index
    %249 = vector.load %arg5[%c0_69, %c95_70] : memref<2x512xf32, #tpu.memory_space<vmem>>, vector<1x256xf32>
    %c1_71 = arith.constant 1 : index
    %c95_72 = arith.constant 95 : index
    %250 = vector.load %arg5[%c1_71, %c95_72] : memref<2x512xf32, #tpu.memory_space<vmem>>, vector<1x256xf32>
    %251 = vector.broadcast %21 : f32 to vector<1x256xf32>
    %252 = arith.mulf %251, %249 : vector<1x256xf32>
    %253 = vector.broadcast %70 : f32 to vector<1x256xf32>
    %254 = arith.mulf %253, %250 : vector<1x256xf32>
    %255 = arith.addf %252, %254 : vector<1x256xf32>
    %256 = arith.mulf %255, %239 : vector<1x256xf32>
    %257 = arith.addf %248, %256 : vector<1x256xf32>
    %c0_73 = arith.constant 0 : index
    %c111 = arith.constant 111 : index
    %258 = vector.load %arg5[%c0_73, %c111] : memref<2x512xf32, #tpu.memory_space<vmem>>, vector<1x256xf32>
    %c1_74 = arith.constant 1 : index
    %c111_75 = arith.constant 111 : index
    %259 = vector.load %arg5[%c1_74, %c111_75] : memref<2x512xf32, #tpu.memory_space<vmem>>, vector<1x256xf32>
    %260 = vector.broadcast %28 : f32 to vector<1x256xf32>
    %261 = arith.mulf %260, %258 : vector<1x256xf32>
    %262 = vector.broadcast %77 : f32 to vector<1x256xf32>
    %263 = arith.mulf %262, %259 : vector<1x256xf32>
    %264 = arith.addf %261, %263 : vector<1x256xf32>
    %265 = arith.mulf %264, %239 : vector<1x256xf32>
    %266 = arith.addf %257, %265 : vector<1x256xf32>
    %c0_76 = arith.constant 0 : index
    %c127 = arith.constant 127 : index
    %267 = vector.load %arg5[%c0_76, %c127] : memref<2x512xf32, #tpu.memory_space<vmem>>, vector<1x256xf32>
    %c1_77 = arith.constant 1 : index
    %c127_78 = arith.constant 127 : index
    %268 = vector.load %arg5[%c1_77, %c127_78] : memref<2x512xf32, #tpu.memory_space<vmem>>, vector<1x256xf32>
    %269 = vector.broadcast %35 : f32 to vector<1x256xf32>
    %270 = arith.mulf %269, %267 : vector<1x256xf32>
    %271 = vector.broadcast %84 : f32 to vector<1x256xf32>
    %272 = arith.mulf %271, %268 : vector<1x256xf32>
    %273 = arith.addf %270, %272 : vector<1x256xf32>
    %274 = arith.mulf %273, %239 : vector<1x256xf32>
    %275 = arith.addf %266, %274 : vector<1x256xf32>
    %c0_79 = arith.constant 0 : index
    %c143 = arith.constant 143 : index
    %276 = vector.load %arg5[%c0_79, %c143] : memref<2x512xf32, #tpu.memory_space<vmem>>, vector<1x256xf32>
    %c1_80 = arith.constant 1 : index
    %c143_81 = arith.constant 143 : index
    %277 = vector.load %arg5[%c1_80, %c143_81] : memref<2x512xf32, #tpu.memory_space<vmem>>, vector<1x256xf32>
    %278 = vector.broadcast %42 : f32 to vector<1x256xf32>
    %279 = arith.mulf %278, %276 : vector<1x256xf32>
    %280 = vector.broadcast %91 : f32 to vector<1x256xf32>
    %281 = arith.mulf %280, %277 : vector<1x256xf32>
    %282 = arith.addf %279, %281 : vector<1x256xf32>
    %283 = arith.mulf %282, %239 : vector<1x256xf32>
    %284 = arith.addf %275, %283 : vector<1x256xf32>
    %c0_82 = arith.constant 0 : index
    %c159 = arith.constant 159 : index
    %285 = vector.load %arg5[%c0_82, %c159] : memref<2x512xf32, #tpu.memory_space<vmem>>, vector<1x256xf32>
    %c1_83 = arith.constant 1 : index
    %c159_84 = arith.constant 159 : index
    %286 = vector.load %arg5[%c1_83, %c159_84] : memref<2x512xf32, #tpu.memory_space<vmem>>, vector<1x256xf32>
    %287 = vector.broadcast %49 : f32 to vector<1x256xf32>
    %288 = arith.mulf %287, %285 : vector<1x256xf32>
    %289 = vector.broadcast %98 : f32 to vector<1x256xf32>
    %290 = arith.mulf %289, %286 : vector<1x256xf32>
    %291 = arith.addf %288, %290 : vector<1x256xf32>
    %292 = arith.mulf %291, %239 : vector<1x256xf32>
    %293 = arith.addf %284, %292 : vector<1x256xf32>
    %c0_85 = arith.constant 0 : index
    %c175 = arith.constant 175 : index
    %294 = vector.load %arg5[%c0_85, %c175] : memref<2x512xf32, #tpu.memory_space<vmem>>, vector<1x256xf32>
    %c1_86 = arith.constant 1 : index
    %c175_87 = arith.constant 175 : index
    %295 = vector.load %arg5[%c1_86, %c175_87] : memref<2x512xf32, #tpu.memory_space<vmem>>, vector<1x256xf32>
    %296 = vector.broadcast %56 : f32 to vector<1x256xf32>
    %297 = arith.mulf %296, %294 : vector<1x256xf32>
    %298 = vector.broadcast %105 : f32 to vector<1x256xf32>
    %299 = arith.mulf %298, %295 : vector<1x256xf32>
    %300 = arith.addf %297, %299 : vector<1x256xf32>
    %301 = arith.mulf %300, %239 : vector<1x256xf32>
    %302 = arith.addf %293, %301 : vector<1x256xf32>
    %c3_88 = arith.constant 3 : index
    %c0_89 = arith.constant 0 : index
    %303 = vector.load %arg2[%c3_88, %c0_89] : memref<7x256xf32, #tpu.memory_space<vmem>>, vector<1x256xf32>
    %c0_90 = arith.constant 0 : index
    %c80_91 = arith.constant 80 : index
    %304 = vector.load %arg5[%c0_90, %c80_91] : memref<2x512xf32, #tpu.memory_space<vmem>>, vector<1x256xf32>
    %c1_92 = arith.constant 1 : index
    %c80_93 = arith.constant 80 : index
    %305 = vector.load %arg5[%c1_92, %c80_93] : memref<2x512xf32, #tpu.memory_space<vmem>>, vector<1x256xf32>
    %306 = vector.broadcast %15 : f32 to vector<1x256xf32>
    %307 = arith.mulf %306, %304 : vector<1x256xf32>
    %308 = vector.broadcast %64 : f32 to vector<1x256xf32>
    %309 = arith.mulf %308, %305 : vector<1x256xf32>
    %310 = arith.addf %307, %309 : vector<1x256xf32>
    %311 = arith.mulf %310, %303 : vector<1x256xf32>
    %312 = arith.addf %302, %311 : vector<1x256xf32>
    %c0_94 = arith.constant 0 : index
    %c96_95 = arith.constant 96 : index
    %313 = vector.load %arg5[%c0_94, %c96_95] : memref<2x512xf32, #tpu.memory_space<vmem>>, vector<1x256xf32>
    %c1_96 = arith.constant 1 : index
    %c96_97 = arith.constant 96 : index
    %314 = vector.load %arg5[%c1_96, %c96_97] : memref<2x512xf32, #tpu.memory_space<vmem>>, vector<1x256xf32>
    %315 = vector.broadcast %22 : f32 to vector<1x256xf32>
    %316 = arith.mulf %315, %313 : vector<1x256xf32>
    %317 = vector.broadcast %71 : f32 to vector<1x256xf32>
    %318 = arith.mulf %317, %314 : vector<1x256xf32>
    %319 = arith.addf %316, %318 : vector<1x256xf32>
    %320 = arith.mulf %319, %303 : vector<1x256xf32>
    %321 = arith.addf %312, %320 : vector<1x256xf32>
    %c0_98 = arith.constant 0 : index
    %c112 = arith.constant 112 : index
    %322 = vector.load %arg5[%c0_98, %c112] : memref<2x512xf32, #tpu.memory_space<vmem>>, vector<1x256xf32>
    %c1_99 = arith.constant 1 : index
    %c112_100 = arith.constant 112 : index
    %323 = vector.load %arg5[%c1_99, %c112_100] : memref<2x512xf32, #tpu.memory_space<vmem>>, vector<1x256xf32>
    %324 = vector.broadcast %29 : f32 to vector<1x256xf32>
    %325 = arith.mulf %324, %322 : vector<1x256xf32>
    %326 = vector.broadcast %78 : f32 to vector<1x256xf32>
    %327 = arith.mulf %326, %323 : vector<1x256xf32>
    %328 = arith.addf %325, %327 : vector<1x256xf32>
    %329 = arith.mulf %328, %303 : vector<1x256xf32>
    %330 = arith.addf %321, %329 : vector<1x256xf32>
    %c0_101 = arith.constant 0 : index
    %c128_102 = arith.constant 128 : index
    %331 = vector.load %arg5[%c0_101, %c128_102] : memref<2x512xf32, #tpu.memory_space<vmem>>, vector<1x256xf32>
    %c1_103 = arith.constant 1 : index
    %c128_104 = arith.constant 128 : index
    %332 = vector.load %arg5[%c1_103, %c128_104] : memref<2x512xf32, #tpu.memory_space<vmem>>, vector<1x256xf32>
    %333 = vector.broadcast %36 : f32 to vector<1x256xf32>
    %334 = arith.mulf %333, %331 : vector<1x256xf32>
    %335 = vector.broadcast %85 : f32 to vector<1x256xf32>
    %336 = arith.mulf %335, %332 : vector<1x256xf32>
    %337 = arith.addf %334, %336 : vector<1x256xf32>
    %338 = arith.mulf %337, %303 : vector<1x256xf32>
    %339 = arith.addf %330, %338 : vector<1x256xf32>
    %c0_105 = arith.constant 0 : index
    %c144 = arith.constant 144 : index
    %340 = vector.load %arg5[%c0_105, %c144] : memref<2x512xf32, #tpu.memory_space<vmem>>, vector<1x256xf32>
    %c1_106 = arith.constant 1 : index
    %c144_107 = arith.constant 144 : index
    %341 = vector.load %arg5[%c1_106, %c144_107] : memref<2x512xf32, #tpu.memory_space<vmem>>, vector<1x256xf32>
    %342 = vector.broadcast %43 : f32 to vector<1x256xf32>
    %343 = arith.mulf %342, %340 : vector<1x256xf32>
    %344 = vector.broadcast %92 : f32 to vector<1x256xf32>
    %345 = arith.mulf %344, %341 : vector<1x256xf32>
    %346 = arith.addf %343, %345 : vector<1x256xf32>
    %347 = arith.mulf %346, %303 : vector<1x256xf32>
    %348 = arith.addf %339, %347 : vector<1x256xf32>
    %c0_108 = arith.constant 0 : index
    %c160 = arith.constant 160 : index
    %349 = vector.load %arg5[%c0_108, %c160] : memref<2x512xf32, #tpu.memory_space<vmem>>, vector<1x256xf32>
    %c1_109 = arith.constant 1 : index
    %c160_110 = arith.constant 160 : index
    %350 = vector.load %arg5[%c1_109, %c160_110] : memref<2x512xf32, #tpu.memory_space<vmem>>, vector<1x256xf32>
    %351 = vector.broadcast %50 : f32 to vector<1x256xf32>
    %352 = arith.mulf %351, %349 : vector<1x256xf32>
    %353 = vector.broadcast %99 : f32 to vector<1x256xf32>
    %354 = arith.mulf %353, %350 : vector<1x256xf32>
    %355 = arith.addf %352, %354 : vector<1x256xf32>
    %356 = arith.mulf %355, %303 : vector<1x256xf32>
    %357 = arith.addf %348, %356 : vector<1x256xf32>
    %c0_111 = arith.constant 0 : index
    %c176 = arith.constant 176 : index
    %358 = vector.load %arg5[%c0_111, %c176] : memref<2x512xf32, #tpu.memory_space<vmem>>, vector<1x256xf32>
    %c1_112 = arith.constant 1 : index
    %c176_113 = arith.constant 176 : index
    %359 = vector.load %arg5[%c1_112, %c176_113] : memref<2x512xf32, #tpu.memory_space<vmem>>, vector<1x256xf32>
    %360 = vector.broadcast %57 : f32 to vector<1x256xf32>
    %361 = arith.mulf %360, %358 : vector<1x256xf32>
    %362 = vector.broadcast %106 : f32 to vector<1x256xf32>
    %363 = arith.mulf %362, %359 : vector<1x256xf32>
    %364 = arith.addf %361, %363 : vector<1x256xf32>
    %365 = arith.mulf %364, %303 : vector<1x256xf32>
    %366 = arith.addf %357, %365 : vector<1x256xf32>
    %c4_114 = arith.constant 4 : index
    %c0_115 = arith.constant 0 : index
    %367 = vector.load %arg2[%c4_114, %c0_115] : memref<7x256xf32, #tpu.memory_space<vmem>>, vector<1x256xf32>
    %c0_116 = arith.constant 0 : index
    %c81_117 = arith.constant 81 : index
    %368 = vector.load %arg5[%c0_116, %c81_117] : memref<2x512xf32, #tpu.memory_space<vmem>>, vector<1x256xf32>
    %c1_118 = arith.constant 1 : index
    %c81_119 = arith.constant 81 : index
    %369 = vector.load %arg5[%c1_118, %c81_119] : memref<2x512xf32, #tpu.memory_space<vmem>>, vector<1x256xf32>
    %370 = vector.broadcast %16 : f32 to vector<1x256xf32>
    %371 = arith.mulf %370, %368 : vector<1x256xf32>
    %372 = vector.broadcast %65 : f32 to vector<1x256xf32>
    %373 = arith.mulf %372, %369 : vector<1x256xf32>
    %374 = arith.addf %371, %373 : vector<1x256xf32>
    %375 = arith.mulf %374, %367 : vector<1x256xf32>
    %376 = arith.addf %366, %375 : vector<1x256xf32>
    %c0_120 = arith.constant 0 : index
    %c97_121 = arith.constant 97 : index
    %377 = vector.load %arg5[%c0_120, %c97_121] : memref<2x512xf32, #tpu.memory_space<vmem>>, vector<1x256xf32>
    %c1_122 = arith.constant 1 : index
    %c97_123 = arith.constant 97 : index
    %378 = vector.load %arg5[%c1_122, %c97_123] : memref<2x512xf32, #tpu.memory_space<vmem>>, vector<1x256xf32>
    %379 = vector.broadcast %23 : f32 to vector<1x256xf32>
    %380 = arith.mulf %379, %377 : vector<1x256xf32>
    %381 = vector.broadcast %72 : f32 to vector<1x256xf32>
    %382 = arith.mulf %381, %378 : vector<1x256xf32>
    %383 = arith.addf %380, %382 : vector<1x256xf32>
    %384 = arith.mulf %383, %367 : vector<1x256xf32>
    %385 = arith.addf %376, %384 : vector<1x256xf32>
    %c0_124 = arith.constant 0 : index
    %c113 = arith.constant 113 : index
    %386 = vector.load %arg5[%c0_124, %c113] : memref<2x512xf32, #tpu.memory_space<vmem>>, vector<1x256xf32>
    %c1_125 = arith.constant 1 : index
    %c113_126 = arith.constant 113 : index
    %387 = vector.load %arg5[%c1_125, %c113_126] : memref<2x512xf32, #tpu.memory_space<vmem>>, vector<1x256xf32>
    %388 = vector.broadcast %30 : f32 to vector<1x256xf32>
    %389 = arith.mulf %388, %386 : vector<1x256xf32>
    %390 = vector.broadcast %79 : f32 to vector<1x256xf32>
    %391 = arith.mulf %390, %387 : vector<1x256xf32>
    %392 = arith.addf %389, %391 : vector<1x256xf32>
    %393 = arith.mulf %392, %367 : vector<1x256xf32>
    %394 = arith.addf %385, %393 : vector<1x256xf32>
    %c0_127 = arith.constant 0 : index
    %c129 = arith.constant 129 : index
    %395 = vector.load %arg5[%c0_127, %c129] : memref<2x512xf32, #tpu.memory_space<vmem>>, vector<1x256xf32>
    %c1_128 = arith.constant 1 : index
    %c129_129 = arith.constant 129 : index
    %396 = vector.load %arg5[%c1_128, %c129_129] : memref<2x512xf32, #tpu.memory_space<vmem>>, vector<1x256xf32>
    %397 = vector.broadcast %37 : f32 to vector<1x256xf32>
    %398 = arith.mulf %397, %395 : vector<1x256xf32>
    %399 = vector.broadcast %86 : f32 to vector<1x256xf32>
    %400 = arith.mulf %399, %396 : vector<1x256xf32>
    %401 = arith.addf %398, %400 : vector<1x256xf32>
    %402 = arith.mulf %401, %367 : vector<1x256xf32>
    %403 = arith.addf %394, %402 : vector<1x256xf32>
    %c0_130 = arith.constant 0 : index
    %c145 = arith.constant 145 : index
    %404 = vector.load %arg5[%c0_130, %c145] : memref<2x512xf32, #tpu.memory_space<vmem>>, vector<1x256xf32>
    %c1_131 = arith.constant 1 : index
    %c145_132 = arith.constant 145 : index
    %405 = vector.load %arg5[%c1_131, %c145_132] : memref<2x512xf32, #tpu.memory_space<vmem>>, vector<1x256xf32>
    %406 = vector.broadcast %44 : f32 to vector<1x256xf32>
    %407 = arith.mulf %406, %404 : vector<1x256xf32>
    %408 = vector.broadcast %93 : f32 to vector<1x256xf32>
    %409 = arith.mulf %408, %405 : vector<1x256xf32>
    %410 = arith.addf %407, %409 : vector<1x256xf32>
    %411 = arith.mulf %410, %367 : vector<1x256xf32>
    %412 = arith.addf %403, %411 : vector<1x256xf32>
    %c0_133 = arith.constant 0 : index
    %c161 = arith.constant 161 : index
    %413 = vector.load %arg5[%c0_133, %c161] : memref<2x512xf32, #tpu.memory_space<vmem>>, vector<1x256xf32>
    %c1_134 = arith.constant 1 : index
    %c161_135 = arith.constant 161 : index
    %414 = vector.load %arg5[%c1_134, %c161_135] : memref<2x512xf32, #tpu.memory_space<vmem>>, vector<1x256xf32>
    %415 = vector.broadcast %51 : f32 to vector<1x256xf32>
    %416 = arith.mulf %415, %413 : vector<1x256xf32>
    %417 = vector.broadcast %100 : f32 to vector<1x256xf32>
    %418 = arith.mulf %417, %414 : vector<1x256xf32>
    %419 = arith.addf %416, %418 : vector<1x256xf32>
    %420 = arith.mulf %419, %367 : vector<1x256xf32>
    %421 = arith.addf %412, %420 : vector<1x256xf32>
    %c0_136 = arith.constant 0 : index
    %c177 = arith.constant 177 : index
    %422 = vector.load %arg5[%c0_136, %c177] : memref<2x512xf32, #tpu.memory_space<vmem>>, vector<1x256xf32>
    %c1_137 = arith.constant 1 : index
    %c177_138 = arith.constant 177 : index
    %423 = vector.load %arg5[%c1_137, %c177_138] : memref<2x512xf32, #tpu.memory_space<vmem>>, vector<1x256xf32>
    %424 = vector.broadcast %58 : f32 to vector<1x256xf32>
    %425 = arith.mulf %424, %422 : vector<1x256xf32>
    %426 = vector.broadcast %107 : f32 to vector<1x256xf32>
    %427 = arith.mulf %426, %423 : vector<1x256xf32>
    %428 = arith.addf %425, %427 : vector<1x256xf32>
    %429 = arith.mulf %428, %367 : vector<1x256xf32>
    %430 = arith.addf %421, %429 : vector<1x256xf32>
    %c5_139 = arith.constant 5 : index
    %c0_140 = arith.constant 0 : index
    %431 = vector.load %arg2[%c5_139, %c0_140] : memref<7x256xf32, #tpu.memory_space<vmem>>, vector<1x256xf32>
    %c0_141 = arith.constant 0 : index
    %c82_142 = arith.constant 82 : index
    %432 = vector.load %arg5[%c0_141, %c82_142] : memref<2x512xf32, #tpu.memory_space<vmem>>, vector<1x256xf32>
    %c1_143 = arith.constant 1 : index
    %c82_144 = arith.constant 82 : index
    %433 = vector.load %arg5[%c1_143, %c82_144] : memref<2x512xf32, #tpu.memory_space<vmem>>, vector<1x256xf32>
    %434 = vector.broadcast %17 : f32 to vector<1x256xf32>
    %435 = arith.mulf %434, %432 : vector<1x256xf32>
    %436 = vector.broadcast %66 : f32 to vector<1x256xf32>
    %437 = arith.mulf %436, %433 : vector<1x256xf32>
    %438 = arith.addf %435, %437 : vector<1x256xf32>
    %439 = arith.mulf %438, %431 : vector<1x256xf32>
    %440 = arith.addf %430, %439 : vector<1x256xf32>
    %c0_145 = arith.constant 0 : index
    %c98 = arith.constant 98 : index
    %441 = vector.load %arg5[%c0_145, %c98] : memref<2x512xf32, #tpu.memory_space<vmem>>, vector<1x256xf32>
    %c1_146 = arith.constant 1 : index
    %c98_147 = arith.constant 98 : index
    %442 = vector.load %arg5[%c1_146, %c98_147] : memref<2x512xf32, #tpu.memory_space<vmem>>, vector<1x256xf32>
    %443 = vector.broadcast %24 : f32 to vector<1x256xf32>
    %444 = arith.mulf %443, %441 : vector<1x256xf32>
    %445 = vector.broadcast %73 : f32 to vector<1x256xf32>
    %446 = arith.mulf %445, %442 : vector<1x256xf32>
    %447 = arith.addf %444, %446 : vector<1x256xf32>
    %448 = arith.mulf %447, %431 : vector<1x256xf32>
    %449 = arith.addf %440, %448 : vector<1x256xf32>
    %c0_148 = arith.constant 0 : index
    %c114 = arith.constant 114 : index
    %450 = vector.load %arg5[%c0_148, %c114] : memref<2x512xf32, #tpu.memory_space<vmem>>, vector<1x256xf32>
    %c1_149 = arith.constant 1 : index
    %c114_150 = arith.constant 114 : index
    %451 = vector.load %arg5[%c1_149, %c114_150] : memref<2x512xf32, #tpu.memory_space<vmem>>, vector<1x256xf32>
    %452 = vector.broadcast %31 : f32 to vector<1x256xf32>
    %453 = arith.mulf %452, %450 : vector<1x256xf32>
    %454 = vector.broadcast %80 : f32 to vector<1x256xf32>
    %455 = arith.mulf %454, %451 : vector<1x256xf32>
    %456 = arith.addf %453, %455 : vector<1x256xf32>
    %457 = arith.mulf %456, %431 : vector<1x256xf32>
    %458 = arith.addf %449, %457 : vector<1x256xf32>
    %c0_151 = arith.constant 0 : index
    %c130 = arith.constant 130 : index
    %459 = vector.load %arg5[%c0_151, %c130] : memref<2x512xf32, #tpu.memory_space<vmem>>, vector<1x256xf32>
    %c1_152 = arith.constant 1 : index
    %c130_153 = arith.constant 130 : index
    %460 = vector.load %arg5[%c1_152, %c130_153] : memref<2x512xf32, #tpu.memory_space<vmem>>, vector<1x256xf32>
    %461 = vector.broadcast %38 : f32 to vector<1x256xf32>
    %462 = arith.mulf %461, %459 : vector<1x256xf32>
    %463 = vector.broadcast %87 : f32 to vector<1x256xf32>
    %464 = arith.mulf %463, %460 : vector<1x256xf32>
    %465 = arith.addf %462, %464 : vector<1x256xf32>
    %466 = arith.mulf %465, %431 : vector<1x256xf32>
    %467 = arith.addf %458, %466 : vector<1x256xf32>
    %c0_154 = arith.constant 0 : index
    %c146 = arith.constant 146 : index
    %468 = vector.load %arg5[%c0_154, %c146] : memref<2x512xf32, #tpu.memory_space<vmem>>, vector<1x256xf32>
    %c1_155 = arith.constant 1 : index
    %c146_156 = arith.constant 146 : index
    %469 = vector.load %arg5[%c1_155, %c146_156] : memref<2x512xf32, #tpu.memory_space<vmem>>, vector<1x256xf32>
    %470 = vector.broadcast %45 : f32 to vector<1x256xf32>
    %471 = arith.mulf %470, %468 : vector<1x256xf32>
    %472 = vector.broadcast %94 : f32 to vector<1x256xf32>
    %473 = arith.mulf %472, %469 : vector<1x256xf32>
    %474 = arith.addf %471, %473 : vector<1x256xf32>
    %475 = arith.mulf %474, %431 : vector<1x256xf32>
    %476 = arith.addf %467, %475 : vector<1x256xf32>
    %c0_157 = arith.constant 0 : index
    %c162 = arith.constant 162 : index
    %477 = vector.load %arg5[%c0_157, %c162] : memref<2x512xf32, #tpu.memory_space<vmem>>, vector<1x256xf32>
    %c1_158 = arith.constant 1 : index
    %c162_159 = arith.constant 162 : index
    %478 = vector.load %arg5[%c1_158, %c162_159] : memref<2x512xf32, #tpu.memory_space<vmem>>, vector<1x256xf32>
    %479 = vector.broadcast %52 : f32 to vector<1x256xf32>
    %480 = arith.mulf %479, %477 : vector<1x256xf32>
    %481 = vector.broadcast %101 : f32 to vector<1x256xf32>
    %482 = arith.mulf %481, %478 : vector<1x256xf32>
    %483 = arith.addf %480, %482 : vector<1x256xf32>
    %484 = arith.mulf %483, %431 : vector<1x256xf32>
    %485 = arith.addf %476, %484 : vector<1x256xf32>
    %c0_160 = arith.constant 0 : index
    %c178 = arith.constant 178 : index
    %486 = vector.load %arg5[%c0_160, %c178] : memref<2x512xf32, #tpu.memory_space<vmem>>, vector<1x256xf32>
    %c1_161 = arith.constant 1 : index
    %c178_162 = arith.constant 178 : index
    %487 = vector.load %arg5[%c1_161, %c178_162] : memref<2x512xf32, #tpu.memory_space<vmem>>, vector<1x256xf32>
    %488 = vector.broadcast %59 : f32 to vector<1x256xf32>
    %489 = arith.mulf %488, %486 : vector<1x256xf32>
    %490 = vector.broadcast %108 : f32 to vector<1x256xf32>
    %491 = arith.mulf %490, %487 : vector<1x256xf32>
    %492 = arith.addf %489, %491 : vector<1x256xf32>
    %493 = arith.mulf %492, %431 : vector<1x256xf32>
    %494 = arith.addf %485, %493 : vector<1x256xf32>
    %c6_163 = arith.constant 6 : index
    %c0_164 = arith.constant 0 : index
    %495 = vector.load %arg2[%c6_163, %c0_164] : memref<7x256xf32, #tpu.memory_space<vmem>>, vector<1x256xf32>
    %c0_165 = arith.constant 0 : index
    %c83_166 = arith.constant 83 : index
    %496 = vector.load %arg5[%c0_165, %c83_166] : memref<2x512xf32, #tpu.memory_space<vmem>>, vector<1x256xf32>
    %c1_167 = arith.constant 1 : index
    %c83_168 = arith.constant 83 : index
    %497 = vector.load %arg5[%c1_167, %c83_168] : memref<2x512xf32, #tpu.memory_space<vmem>>, vector<1x256xf32>
    %498 = vector.broadcast %18 : f32 to vector<1x256xf32>
    %499 = arith.mulf %498, %496 : vector<1x256xf32>
    %500 = vector.broadcast %67 : f32 to vector<1x256xf32>
    %501 = arith.mulf %500, %497 : vector<1x256xf32>
    %502 = arith.addf %499, %501 : vector<1x256xf32>
    %503 = arith.mulf %502, %495 : vector<1x256xf32>
    %504 = arith.addf %494, %503 : vector<1x256xf32>
    %c0_169 = arith.constant 0 : index
    %c99 = arith.constant 99 : index
    %505 = vector.load %arg5[%c0_169, %c99] : memref<2x512xf32, #tpu.memory_space<vmem>>, vector<1x256xf32>
    %c1_170 = arith.constant 1 : index
    %c99_171 = arith.constant 99 : index
    %506 = vector.load %arg5[%c1_170, %c99_171] : memref<2x512xf32, #tpu.memory_space<vmem>>, vector<1x256xf32>
    %507 = vector.broadcast %25 : f32 to vector<1x256xf32>
    %508 = arith.mulf %507, %505 : vector<1x256xf32>
    %509 = vector.broadcast %74 : f32 to vector<1x256xf32>
    %510 = arith.mulf %509, %506 : vector<1x256xf32>
    %511 = arith.addf %508, %510 : vector<1x256xf32>
    %512 = arith.mulf %511, %495 : vector<1x256xf32>
    %513 = arith.addf %504, %512 : vector<1x256xf32>
    %c0_172 = arith.constant 0 : index
    %c115 = arith.constant 115 : index
    %514 = vector.load %arg5[%c0_172, %c115] : memref<2x512xf32, #tpu.memory_space<vmem>>, vector<1x256xf32>
    %c1_173 = arith.constant 1 : index
    %c115_174 = arith.constant 115 : index
    %515 = vector.load %arg5[%c1_173, %c115_174] : memref<2x512xf32, #tpu.memory_space<vmem>>, vector<1x256xf32>
    %516 = vector.broadcast %32 : f32 to vector<1x256xf32>
    %517 = arith.mulf %516, %514 : vector<1x256xf32>
    %518 = vector.broadcast %81 : f32 to vector<1x256xf32>
    %519 = arith.mulf %518, %515 : vector<1x256xf32>
    %520 = arith.addf %517, %519 : vector<1x256xf32>
    %521 = arith.mulf %520, %495 : vector<1x256xf32>
    %522 = arith.addf %513, %521 : vector<1x256xf32>
    %c0_175 = arith.constant 0 : index
    %c131 = arith.constant 131 : index
    %523 = vector.load %arg5[%c0_175, %c131] : memref<2x512xf32, #tpu.memory_space<vmem>>, vector<1x256xf32>
    %c1_176 = arith.constant 1 : index
    %c131_177 = arith.constant 131 : index
    %524 = vector.load %arg5[%c1_176, %c131_177] : memref<2x512xf32, #tpu.memory_space<vmem>>, vector<1x256xf32>
    %525 = vector.broadcast %39 : f32 to vector<1x256xf32>
    %526 = arith.mulf %525, %523 : vector<1x256xf32>
    %527 = vector.broadcast %88 : f32 to vector<1x256xf32>
    %528 = arith.mulf %527, %524 : vector<1x256xf32>
    %529 = arith.addf %526, %528 : vector<1x256xf32>
    %530 = arith.mulf %529, %495 : vector<1x256xf32>
    %531 = arith.addf %522, %530 : vector<1x256xf32>
    %c0_178 = arith.constant 0 : index
    %c147 = arith.constant 147 : index
    %532 = vector.load %arg5[%c0_178, %c147] : memref<2x512xf32, #tpu.memory_space<vmem>>, vector<1x256xf32>
    %c1_179 = arith.constant 1 : index
    %c147_180 = arith.constant 147 : index
    %533 = vector.load %arg5[%c1_179, %c147_180] : memref<2x512xf32, #tpu.memory_space<vmem>>, vector<1x256xf32>
    %534 = vector.broadcast %46 : f32 to vector<1x256xf32>
    %535 = arith.mulf %534, %532 : vector<1x256xf32>
    %536 = vector.broadcast %95 : f32 to vector<1x256xf32>
    %537 = arith.mulf %536, %533 : vector<1x256xf32>
    %538 = arith.addf %535, %537 : vector<1x256xf32>
    %539 = arith.mulf %538, %495 : vector<1x256xf32>
    %540 = arith.addf %531, %539 : vector<1x256xf32>
    %c0_181 = arith.constant 0 : index
    %c163 = arith.constant 163 : index
    %541 = vector.load %arg5[%c0_181, %c163] : memref<2x512xf32, #tpu.memory_space<vmem>>, vector<1x256xf32>
    %c1_182 = arith.constant 1 : index
    %c163_183 = arith.constant 163 : index
    %542 = vector.load %arg5[%c1_182, %c163_183] : memref<2x512xf32, #tpu.memory_space<vmem>>, vector<1x256xf32>
    %543 = vector.broadcast %53 : f32 to vector<1x256xf32>
    %544 = arith.mulf %543, %541 : vector<1x256xf32>
    %545 = vector.broadcast %102 : f32 to vector<1x256xf32>
    %546 = arith.mulf %545, %542 : vector<1x256xf32>
    %547 = arith.addf %544, %546 : vector<1x256xf32>
    %548 = arith.mulf %547, %495 : vector<1x256xf32>
    %549 = arith.addf %540, %548 : vector<1x256xf32>
    %c0_184 = arith.constant 0 : index
    %c179 = arith.constant 179 : index
    %550 = vector.load %arg5[%c0_184, %c179] : memref<2x512xf32, #tpu.memory_space<vmem>>, vector<1x256xf32>
    %c1_185 = arith.constant 1 : index
    %c179_186 = arith.constant 179 : index
    %551 = vector.load %arg5[%c1_185, %c179_186] : memref<2x512xf32, #tpu.memory_space<vmem>>, vector<1x256xf32>
    %552 = vector.broadcast %60 : f32 to vector<1x256xf32>
    %553 = arith.mulf %552, %550 : vector<1x256xf32>
    %554 = vector.broadcast %109 : f32 to vector<1x256xf32>
    %555 = arith.mulf %554, %551 : vector<1x256xf32>
    %556 = arith.addf %553, %555 : vector<1x256xf32>
    %557 = arith.mulf %556, %495 : vector<1x256xf32>
    %558 = arith.addf %549, %557 : vector<1x256xf32>
    %559 = arith.negf %558 : vector<1x256xf32>
    %560 = math.exp %559 : vector<1x256xf32>
    %cst_187 = arith.constant 1.000000e+00 : f32
    %561 = vector.broadcast %cst_187 : f32 to vector<1x256xf32>
    %562 = arith.addf %561, %560 : vector<1x256xf32>
    %563 = arith.divf %561, %562 : vector<1x256xf32>
    %c0_188 = arith.constant 0 : index
    %c0_189 = arith.constant 0 : index
    %c0_190 = arith.constant 0 : index
    %564 = vector.load %arg4[%c0_188, %c0_189, %c0_190] : memref<1x1x256xf32, #tpu.memory_space<vmem>>, vector<1x1x256xf32>
    %565 = vector.shape_cast %564 : vector<1x1x256xf32> to vector<1x256xf32>
    %566 = vector.shape_cast %563 : vector<1x256xf32> to vector<1x1x256xf32>
    tpu.vector_store %arg4[%c0_188, %c0_189, %c0_190], %566 {strides = array<i32>} : memref<1x1x256xf32, #tpu.memory_space<vmem>>, vector<1x1x256xf32>,
    return
  }
  func.func @transform_0(%arg0: i32) -> i32 {
    %c0_i32 = arith.constant 0 : i32
    %c0_i32_0 = arith.constant 0 : i32
    return %c0_i32 : i32
  }
  func.func @transform_1(%arg0: i32) -> (i32, i32) {
    %c0_i32 = arith.constant 0 : i32
    %c0_i32_0 = arith.constant 0 : i32
    %c0_i32_1 = arith.constant 0 : i32
    return %c0_i32, %c0_i32_0 : i32, i32
  }
  func.func @transform_2(%arg0: i32) -> (i32, i32, i32) {
    %c0_i32 = arith.constant 0 : i32
    %c0_i32_0 = arith.constant 0 : i32
    %c0_i32_1 = arith.constant 0 : i32
    return %arg0, %c0_i32, %c0_i32_0 : i32, i32, i32
  }
  func.func @transform_3(%arg0: i32) -> (i32, i32, i32) {
    %c0_i32 = arith.constant 0 : i32
    %c0_i32_0 = arith.constant 0 : i32
    %c0_i32_1 = arith.constant 0 : i32
    return %arg0, %c0_i32, %c0_i32_0 : i32, i32, i32
  }
}

</mosaic_0001>

<bundles_post_ra>
// kernel: tpu_custom_call.1
= control target key start
LH: loop header
LB: loop body
LE: loop exit
PB: predicated region body
PF: predicated region fallthrough
CT: control target
= control target key end

     0   :  { %8 = vsyncpa [#allocation6], 0  ;;  %s2867_s0 = inlined_call_operand.hbm [shape: f32[98], index: 0, kind: input, shape index: {}]   ;;  %s2868_s1 = inlined_call_operand.hbm [shape: f32[7,256], index: 1, kind: input, shape index: {}]   ;;  %s2869_s2 = inlined_call_operand.hbm [shape: f32[2,4,256], index: 2, kind: input, shape index: {}]   ;;  %s2870_s3 = inlined_call_operand.hbm [shape: f32[2,1,256], index: 3, kind: output, shape index: {}]  }
   0x1   :  { %9 = vsyncpa [#allocation4], 0 }
   0x2   :  { %10 = vsyncpa [#allocation9], 0 }
   0x3   :  { %12 = vsyncpa [#allocation9 + $0x1], 0 }
   0x4   :  { %13 = vsyncpa [#allocation5], 0 }
   0x5   :  { %15 = vsyncpa [#allocation5 + $0x1], 0  ;;  %s1999_s12 = smov 0   ;;  %s2001_s13 = smov 0  }
   0x6   :  { %s2003_s14 = smov 0   ;;  %s2005_s15 = smov 0  }
   0x7 LB: > { %s2020_s16 = sadd.s32 4294967295, %s1898_s15   ;;  %s1484_s17 = sadd.s32 4294967294, %s1898_s15   ;;  %s1898_s15 = sphi %s2005_s15, %s2949_s15   ;;  %s1894_s14 = sphi %s2003_s14, %s2948_s14   ;;  %s1890_s13 = sphi %s2001_s13, %s2947_s13   ;;  %s1886_s12 = sphi %s1999_s12, %s2946_s12  }
   0x8   : > { %p83_p0 = scmp.ne.s32.totalorder %s1890_s13, %s1886_s12  ;;  %p2871_p1 = scmp.eq.s32.totalorder %s2020_s16, 0 }
   0x9   : > { %p113_p3 = scmp.eq.s32.totalorder %s1484_s17, 1  ;;  %p1485_p5 = scmp.ge.s32.totalorder %s1898_s15, 1 }
   0xa   : > { %p2029_p4 = por %p2871_p1, %p83_p0  ;;  %p120_p7 = scmp.lt.s32.totalorder %s1898_s15, 3 }
   0xb   : > { %p2034_p6 = por %p113_p3, %p83_p0  ;;  %s1900_s21 = smov [#allocation7]  }
   0xc   : > { %s2901_s18 = scalar_select %p2029_p4, 1, 0 }
   0xd   : > { %s2902_s19 = scalar_select %p2034_p6, 1, 0 }
   0xe   : > { %p2039_p8 = pnand %p1485_p5, %p120_p7  ;;  %s142_s22 = sshll.u32 %s1900_s21, 4  ;;  %s2046_s22 = int_to_ptr.vmem [resolvable:$true] %s142_s22 }
   0xf   : > { %s2055_s24 = sadd.s32 1, %s1898_s15   ;;  %s70_s26 = sadd.s32 1, %s1894_s14 }
  0x10   : > { %p1614_p10 = pneg %p2039_p8  ;;  %s67_s25 = ssub.s32 %s1898_s15, %s2055_s24 }
  0x11   : > { %p2060_p12 = scmp.eq.s32.totalorder %s67_s25, 0  ;;  %s1753_s30 = scalar_lea.hbm %s2867_s0, 16 }
  0x12   : > { %p2050_p11 = pnand %p1614_p10, %p2871_p1  ;;  %p1754_p13 = scmp.ne.s32.totalorder %s2867_s0, %s1753_s30 }
  0x13   : > { %p1760_p7 = scmp.lt.u32.totalorder %s1753_s30, %s2867_s0 }
  0x14   : > { %p1755_p0 = pneg %p2050_p11 }
  0x16   : > { %p1756_p3 = pnand %p1755_p0, %p1754_p13 }
  0x18   : > { %p1757_p5 = pneg %p1756_p3 }
  0x1a   : > { %p1762_p10 = pnand %p1760_p7, %p1757_p5 }
  0x1c   : > { %1765 = shalt.err (!%p1762_p10)
}
  0x1d   : > { %s1901_s8 = smov [#allocation3]   ;;  %s1766_s21 = scalar_lea.hbm %s2868_s1, 256 }
  0x1e   : > { %1617 = dma.hbm_to_smem (!%p2050_p11), %s2867_s0, 16, %s1901_s8, [#allocation6]  }
  0x1f   : > { %p1767_p13 = scmp.ne.s32.totalorder %s2868_s1, %s1766_s21  ;;  %p1773_p7 = scmp.lt.u32.totalorder %s1766_s21, %s2868_s1 }
  0x21   : > { %p1769_p3 = pnand %p1767_p13, %p1755_p0 }
  0x23   : > { %p1770_p5 = pneg %p1769_p3 }
  0x25   : > { %p1775_p10 = pnand %p1773_p7, %p1770_p5 }
  0x27   : > { %1778 = shalt.err (!%p1775_p10)
}
  0x28   : > { %s1779_s4 = scalar_lea.vmem %s2046_s22, 256  ;;  %p1787_p6 = scmp.lt.s32.totalorder %s2046_s22, %s2046_s22 }
  0x29   : > { %p1780_p9 = scmp.ne.s32.totalorder %s2046_s22, %s1779_s4  ;;  %p1788_p13 = scmp.lt.s32.totalorder %s1779_s4, %s1779_s4 }
  0x2b   : > { %p1782_p1 = pnand %p1780_p9, %p1755_p0  ;;  %p1789_p3 = por %p1788_p13, %p1787_p6 }
  0x2d   : > { %p1783_p2 = pneg %p1782_p1 }
  0x2f   : > { %p1790_p4 = pnand %p1789_p3, %p1783_p2 }
  0x31   : > { %1793 = shalt.err (!%p1790_p4)
}
  0x32   : > { %1620 = dma.hbm_to_vmem [thread:$0]  (!%p2050_p11), %s2868_s1, 256, %s2046_s22, [#allocation4]  }
  0x33   : > { %s2113_s7 = scalar_select %p2060_p12, %s1894_s14, %s70_s26  }
  0x34   : > { %p77_p1 = scmp.ne.s32.totalorder %s1894_s14, %s1890_s13  ;;  %p78_p2 = scmp.eq.s32.totalorder %s1898_s15, 0 }
  0x35   : > { %p1631_p4 = scmp.lt.s32.totalorder %s1898_s15, 2  ;;  %s153_s23 = sand.u32 1, %s1894_s14  }
  0x36   : > { %p79_p6 = por %p78_p2, %p77_p1  ;;  %p2906_p9 = scmp.eq.s32.totalorder %s2020_s16, 1 }
  0x37   : > { %s1489_s9 = sshll.u32 %s153_s23, 3  ;;  %s1600_s10 = sshll.u32 %s1898_s15, 7 }
  0x38   : > { %p2122_p0 = por %p2906_p9, %p77_p1  ;;  %s2130_s22 = scalar_lea.hbm %s2869_s2, %s1600_s10 }
  0x39   : > { %s157_s26 = scalar_lea.vmem [#allocation8], %s1489_s9  ;;  %p2134_p11 = pnand %p1631_p4, %p79_p6 }
  0x3a   : > { %s2907_s8 = scalar_select %p2122_p0, 1, 0 }
  0x3b   : > { %s165_s27 = sshll.u32 %s157_s26, 4  ;;  %s154_s25 = scalar_lea.sflag [#allocation9], %s153_s23  ;;  %s2132_s27 = int_to_ptr.vmem [resolvable:$true] %s165_s27 }
  0x3c   : > { %s1794_s28 = scalar_lea.hbm %s2130_s22, 128  ;;  %p1796_p5 = pneg %p2134_p11 }
  0x3d   : > { %p1795_p12 = scmp.ne.s32.totalorder %s2130_s22, %s1794_s28  ;;  %s1799_s4 = scalar_lea.hbm %s2869_s2, 256 }
  0x3e   : > { %p1800_p13 = scmp.lt.u32.totalorder %s2130_s22, %s2869_s2  ;;  %p1801_p3 = scmp.lt.u32.totalorder %s1799_s4, %s1794_s28 }
  0x3f   : > { %p1797_p7 = pnand %p1796_p5, %p1795_p12  ;;  %p1803_p2 = scmp.lt.u32.totalorder %s1794_s28, %s2130_s22 }
  0x40   : > { %p1802_p1 = por %p1801_p3, %p1800_p13 }
  0x41   : > { %p1798_p10 = pneg %p1797_p7 }
  0x42   : > { %p1804_p4 = por %p1803_p2, %p1802_p1 }
  0x44   : > { %p1805_p6 = pnand %p1804_p4, %p1798_p10 }
  0x46   : > { %1808 = shalt.err (!%p1805_p6)
}
  0x47   : > { %s1809_s23 = scalar_lea.vmem %s2132_s27, 128  ;;  %s1902_s9 = smov [#allocation8]  }
  0x48   : > { %p1810_p9 = scmp.ne.s32.totalorder %s2132_s27, %s1809_s23  ;;  %s1814_s10 = sshll.u32 %s1902_s9, 4  ;;  %s1815_s10 = int_to_ptr.vmem [resolvable:$false] %s1814_s10 }
  0x49   : > { %s1816_s11 = scalar_lea.vmem %s1815_s10, 256  ;;  %p1817_p0 = scmp.lt.s32.totalorder %s2132_s27, %s1815_s10 }
  0x4a   : > { %p1812_p12 = pnand %p1810_p9, %p1796_p5  ;;  %p1818_p13 = scmp.lt.s32.totalorder %s1816_s11, %s1809_s23 }
  0x4c   : > { %p1813_p7 = pneg %p1812_p12  ;;  %p1819_p3 = por %p1818_p13, %p1817_p0 }
  0x4e   : > { %p1820_p1 = pnand %p1819_p3, %p1813_p7 }
  0x50   : > { %1823 = shalt.err (!%p1820_p1)
}
  0x51   : > { %1624 = dma.hbm_to_vmem [thread:$0]  (!%p2134_p11), %s2130_s22, 128, %s2132_s27, %s154_s25  }
  0x52   : > { %174 = sbr.rel (%p2039_p8) target bundleno = 624 (0x270), region = 32  ;;  %p2909_p5 = scmp.eq.s32.totalorder (!%p2039_p8), %s2020_s16, 0 }
  0x59   : > { %1869 = dma.done.wait (%p2909_p5), [#allocation6], 16   ;;  %p2910_p10 = pmov %p2909_p5 }
  0x5a   : > { %p2911_p2 = pmov %p2909_p5 }
  0x5b   : > { %1871 = vsyncadd (%p2910_p10), [#allocation6], 4294967280 }
  0x5c   : > { %1873 = dma.done.wait (%p2911_p2), [#allocation4], 256   ;;  %p2912_p0 = pmov %p2911_p2 }
  0x5d   : > { %s2174_s17 = sand.u32 1, %s1890_s13   ;;  %p2913_p8 = scmp.ne.s32.totalorder %s2901_s18, 0 }
  0x5e   : > { %1875 = vsyncadd (%p2912_p0), [#allocation4], 4294967040  ;;  %s1495_s20 = sshll.u32 %s2174_s17, 3  ;;  %s185_s22 = scalar_lea.sflag [#allocation9], %s2174_s17 }
  0x5f   : > { %s188_s26 = scalar_lea.vmem [#allocation8], %s1495_s20 }
  0x60   : > { %1877 = dma.done.wait (%p2913_p8), %s185_s22, 128  }
  0x61   : > { %1879 = vsyncadd (%p2913_p8), %s185_s22, 4294967168 }
  0x62   : > { %193 = sfence }
  0x63   : > { %v2182_v0 = vld [vmem:[#allocation7] ss:$8 sm:$0x3]  ;;  %s2876_s27 = smov 125   ;;  %s2875_s21 = smov 93   ;;  %v212_v1 = vld [vmem:[%s188_s26] sm:$0xff]  ;;  %v253_v10 = vlaneseq }
  0x64   : > { %452 = vrot.lane.b32.xlu1 %v2182_v0, %s2876_s27  ;;  %412 = vrot.lane.b32.xlu0 %v2182_v0, %s2875_s21  ;;  %v214_v2 = vcombine.high %v212_v1, %v212_v1  ;;  %vm216_vm0 = vcmask 1043456   ;;  %s1905_s25 = smov 13   ;;  %s2885_s18 = smov 109   ;;  %v1907_v15 = vmov 0.0   ;;  %v1910_v21 = vmov 1966171168  }
  0x65   : > { %v217_v3 = vsel %vm216_vm0, %v212_v1, 0.0  ;;  %v231_v8 = vsel %vm216_vm0, %v212_v1, -inf  ;;  %245 = vst [vmem:[#allocation2] sm:$0x3] %v1907_v15  ;;  %246 = vst [vmem:[#allocation2 + $0x6] sm:$0x3] %v1907_v15  ;;  %v251_v22 = vunpack.c.l.s4 %v1910_v21 }
  0x66   : > { %v218_v4 = vrot.slane %v217_v3, 4  ;;  %v224_v5 = vsel %vm216_vm0, %v214_v2, 0.0  ;;  %v238_v9 = vsel %vm216_vm0, %v214_v2, -inf  ;;  %v232_v13 = vrot.slane %v231_v8, 4  ;;  %s2883_s28 = smov 45   ;;  %s2874_s29 = smov 29  }
  0x67   : > { %v225_v7 = vrot.slane %v224_v5, 4  ;;  %v239_v14 = vrot.slane %v238_v9, 4  ;;  %v532_v16 = vld [vmem:[#allocation7 + $0x1] ss:$8 sm:$0x3]  ;;  %v254_v23 = vshrl.u32 %v253_v10, 7  ;;  %v252_v28 = vunpack.c.0.s8 %v251_v22 }
  0x68   : > { %476 = vrot.lane.b32.xlu1 %v2182_v0, %s1905_s25  ;;  %432 = vrot.lane.b32.xlu0 %v2182_v0, %s2885_s18  ;;  %v219_v6 = vadd.f32 %v218_v4, %v217_v3  ;;  %v233_v19 = vmax.f32 %v231_v8, %v232_v13  ;;  %s2879_s30 = smov 94   ;;  %s2878_s4 = smov 78   ;;  %vm2200_vm1 = vcmp.lt.s32.totalorder %v253_v10, 256  ;;  %v675_v43 = vld [vmem:[#allocation7 + $0x2] ss:$8 sm:$0x3] }
  0x69   : > { %v226_v12 = vadd.f32 %v225_v7, %v224_v5  ;;  %v240_v20 = vmax.f32 %v238_v9, %v239_v14  ;;  %v255_v36 = vsub.s32 %v252_v28, %v254_v23  ;;  %s2881_s5 = smov 126   ;;  %s2880_s6 = smov 110   ;;  %v2215_v47 = vld [vmem:[#allocation7 + $0x3] ss:$8 sm:$0x3]  ;;  %vm2893_vm2 = vcmask 760832  }
  0x6a   : > { %v220_v11 = vrot.slane %v219_v6, 2  ;;  %v234_v26 = vrot.slane %v233_v19, 2  ;;  %s2887_s23 = smov 30   ;;  %s1916_s9 = smov 14   ;;  %vm2894_vm3 = vcmask 891904   ;;  %vm2895_vm4 = vcmask 1022976  }
  0x6b   : > { %v227_v18 = vrot.slane %v226_v12, 2  ;;  %v241_v27 = vrot.slane %v240_v20, 2  ;;  %s2886_s10 = smov 79   ;;  %s2877_s11 = smov 46   ;;  %vm479_vm5 = vcmask 105472   ;;  %vm2891_vm6 = vcmask 236544  }
  0x6c   : > { %516 = vrot.lane.b32.xlu1 %v2182_v0, %s2883_s28  ;;  %496 = vrot.lane.b32.xlu0 %v2182_v0, %s2874_s29  ;;  %v221_v17 = vadd.f32 %v220_v11, %v219_v6  ;;  %v235_v31 = vmax.f32 %v233_v19, %v234_v26  ;;  %s2890_s20 = smov 111   ;;  %s2888_s22 = smov 95   ;;  %v934_v48 = vld [vmem:[#allocation7 + $0x4] ss:$8 sm:$0x3]  ;;  %vm2892_vm7 = vcmask 367616  }
  0x6d   : > { %v228_v25 = vadd.f32 %v227_v18, %v226_v12  ;;  %v242_v32 = vmax.f32 %v240_v20, %v241_v27  ;;  %s1921_s26 = smov 15   ;;  %s1922_s25 = smov 127   ;;  %v1077_v49 = vld [vmem:[#allocation7 + $0x5] ss:$8 sm:$0x3]  ;;  %vm2898_vm8 = vcmask 637952  }
  0x6e   : > { %v222_v24 = vrot.slane %v221_v17, 1  ;;  %v236_v34 = vrot.slane %v235_v31, 1  ;;  %s2882_s29 = smov 31   ;;  %s1925_s21 = smov 96   ;;  %vm2899_vm9 = vcmask 769024   ;;  %vm602_vm10 = vcmask 1031168  }
  0x6f   : > { %v229_v30 = vrot.slane %v228_v25, 1  ;;  %v243_v35 = vrot.slane %v242_v32, 1  ;;  %s1926_s27 = smov 80   ;;  %s1935_s28 = smov 17   ;;  %vm2900_vm11 = vcmask 900096   ;;  %vm757_vm12 = vcmask 121856  }
  0x70   : > { %559 = vrot.lane.b32.xlu1 %v532_v16, %s2879_s30  ;;  %539 = vrot.lane.b32.xlu0 %v532_v16, %s2878_s4  ;;  %v223_v29 = vadd.f32 %v222_v24, %v221_v17  ;;  %v237_v37 = vmax.f32 %v235_v31, %v236_v34  ;;  %s1929_s4 = smov 48   ;;  %s1930_s30 = smov 32   ;;  %v2230_v50 = vld [vmem:[#allocation7 + $0x6] ss:$8 sm:$0x3]  ;;  %vm622_vm13 = vcmask 113664  }
  0x71   : > { %v230_v33 = vadd.f32 %v229_v30, %v228_v25  ;;  %v244_v38 = vmax.f32 %v242_v32, %v243_v35  ;;  %s1937_s18 = smov 33   ;;  %vm650_vm14 = vcmask 384000   ;;  %vm443_vm15 = vcmask 785408   ;;  %p2943_p4 = scmp.ne.s32.totalorder %s2907_s8, 0 }
  0x72   : > { %vm2896_vm0 = vcmask 244736  }
  0x73   : > { %v249_v39 = vcombine.low %v223_v29, %v230_v33  ;;  %v273_v41 = vcombine.low %v237_v37, %v244_v38 }
  0x74   : > { %599 = vrot.lane.b32.xlu1 %v532_v16, %s2881_s5  ;;  %579 = vrot.lane.b32.xlu0 %v532_v16, %s2880_s6  ;;  %s1931_s6 = smov 97   ;;  %s1932_s5 = smov 81  }
  0x75   : > { %v256_v40 = vrot.slane %v249_v39, %v255_v36  ;;  %v280_v45 = vrot.slane %v273_v41, %v255_v36 }
  0x77   : > { %v263_v44 = vrot.slane %v256_v40, %v255_v36  ;;  %v287_v46 = vrot.slane %v280_v45, %v255_v36 }
  0x78   : > { %639 = vrot.lane.b32.xlu1 %v532_v16, %s2887_s23  ;;  %619 = vrot.lane.b32.xlu0 %v532_v16, %s1916_s9  ;;  %s2884_s9 = smov 47   ;;  %s1939_s23 = smov 82  }
  0x79   : > { %270 = vst.msk [vmem:[#allocation2 + $0x2] ss:$2 sm:$0x3] %vm2200_vm1, %v263_v44  ;;  %290 = vst.msk [vmem:[#allocation2 + $0x3] ss:$2 sm:$0x3] %vm2200_vm1, %v287_v46 }
  0x7c   : > { %682 = vrot.lane.b32.xlu1 %v675_v43, %s2886_s10  ;;  %659 = vrot.lane.b32.xlu0 %v532_v16, %s2877_s11  ;;  %s1928_s11 = smov 112   ;;  %s1938_s10 = smov 49  }
  0x80   : > { %718 = vrot.lane.b32.xlu1 %v675_v43, %s2890_s20  ;;  %700 = vrot.lane.b32.xlu0 %v675_v43, %s2888_s22  ;;  %s1945_s22 = smov 50   ;;  %s1559_s20 = sld [smem:[#allocation3 + $0x3f]]  ;;  %v2238_v51 = vld [vmem:[#allocation2] ss:$2 sm:$0x7] }
  0x81   : > { %v2240_v52 = vld [vmem:[#allocation2 + $0x1] ss:$2 sm:$0x7]  ;;  %v2266_v8 = vld [vmem:[#allocation2 + $0x2] ss:$2 sm:$0x7] }
  0x82   : > { %v2268_v12 = vld [vmem:[#allocation2 + $0x3] ss:$2 sm:$0x7] }
  0x84   : > { %754 = vrot.lane.b32.xlu1 %v675_v43, %s1921_s26  ;;  %736 = vrot.lane.b32.xlu0 %v675_v43, %s1922_s25  ;;  %s1927_s26 = smov 16  }
  0x86   : > { %v429_v58 = vstv %s1559_s20  ;;  %s1950_s20 = smov 19  }
  0x87   : > { %v430_v63 = vmul.f32 %v429_v58, %v2240_v52 }
  0x88   : > { %792 = vrot.lane.b32.xlu1 %v675_v43, %s2884_s9  ;;  %774 = vrot.lane.b32.xlu0 %v675_v43, %s2882_s29  ;;  %s1933_s29 = smov 1   ;;  %s2889_s9 = smov 77  }
  0x8c   : > { %831 = vrot.lane.b32.xlu1 %v2215_v47, %s1925_s21  ;;  %813 = vrot.lane.b32.xlu0 %v2215_v47, %s1926_s27 }
  0x90   : > { %882 = vrot.lane.b32.xlu1 %v2215_v47, %s1927_s26  ;;  %849 = vrot.lane.b32.xlu0 %v2215_v47, %s1928_s11  ;;  %s1934_s26 = smov 113  }
  0x94   : > { %920 = vrot.lane.b32.xlu1 %v2215_v47, %s1929_s4  ;;  %902 = vrot.lane.b32.xlu0 %v2215_v47, %s1930_s30 }
  0x98   : > { %961 = vrot.lane.b32.xlu1 %v934_v48, %s1931_s6  ;;  %941 = vrot.lane.b32.xlu0 %v934_v48, %s1932_s5  ;;  %s1940_s6 = smov 98   ;;  %s1941_s5 = smov 114  }
  0x9c   : > { %1001 = vrot.lane.b32.xlu1 %v934_v48, %s1933_s29  ;;  %981 = vrot.lane.b32.xlu0 %v934_v48, %s1934_s26  ;;  %s1942_s29 = smov 2   ;;  %s1943_s26 = smov 18  }
  0xa0   : > { %1021 = vrot.lane.b32.xlu1 %v934_v48, %s1935_s28  ;;  %399 = vrot.lane.b32.xlu0 %v2182_v0, %s2889_s9  ;;  %s1944_s28 = smov 34   ;;  %s1552_s9 = sld [smem:[#allocation3 + $0x38]] }
  0xa4   : > { %1041 = vrot.lane.b32.xlu1 %v934_v48, %s1937_s18  ;;  %s1503_s18 = sld [smem:[#allocation3 + $0x7]] }
  0xa6   : > { %v409_v54 = vstv %s1552_s9  ;;  %s2254_s9 = sld [smem:[#allocation3 + $0x23]] }
  0xa7   : > { %v410_v56 = vmul.f32 %v409_v54, %v2240_v52 }
  0xa8   : > { %1061 = vrot.lane.b32.xlu1 %v934_v48, %s1938_s10  ;;  %s1946_s10 = smov 83  }
  0xaa   : > { %v407_v53 = vstv %s1503_s18  ;;  %s2256_s18 = sld [smem:[#allocation3 + $0x54]] }
  0xab   : > { %v408_v55 = vmul.f32 %v407_v53, %v2238_v51 }
  0xac   : > { %1084 = vrot.lane.b32.xlu1 %v1077_v49, %s1939_s23  ;;  %s1510_s23 = sld [smem:[#allocation3 + $0xe]]  ;;  %v491_v25 = vstv %s2254_s9 }
  0xad   : > { %v411_v61 = vadd.f32 %v410_v56, %v408_v55  ;;  %v492_v31 = vmul.f32 %v491_v25, %v2266_v8  ;;  %s2310_s9 = sld [smem:[#allocation3 + $0x1e]] }
  0xb0   : > { %1104 = vrot.lane.b32.xlu1 %v1077_v49, %s1940_s6  ;;  %s1947_s6 = smov 99   ;;  %v493_v26 = vstv %s2256_s18  ;;  %s2315_s18 = sld [smem:[#allocation3 + $0x16]] }
  0xb1   : > { %v494_v32 = vmul.f32 %v493_v26, %v2268_v12 }
  0xb2   : > { %v427_v57 = vstv %s1510_s23  ;;  %s2260_s23 = sld [smem:[#allocation3 + $0x2a]] }
  0xb3   : > { %v428_v62 = vmul.f32 %v427_v57, %v2238_v51  ;;  %v495_v40 = vadd.f32 %v494_v32, %v492_v31 }
  0xb4   : > { %1124 = vrot.lane.b32.xlu1 %v1077_v49, %s1941_s5  ;;  %s2234_s5 = sld [smem:[#allocation3 + $0x15]] }
  0xb5   : > { %v431_v10 = vadd.f32 %v430_v63, %v428_v62 }
  0xb8   : > { %1144 = vrot.lane.b32.xlu1 %v1077_v49, %s1942_s29  ;;  %s2236_s29 = sld [smem:[#allocation3 + $0x46]]  ;;  %v511_v27 = vstv %s2260_s23  ;;  %s1953_s23 = smov 64  }
  0xb9   : > { %v512_v37 = vmul.f32 %v511_v27, %v2266_v8 }
  0xba   : > { %v447_v0 = vstv %s2234_s5  ;;  %s1951_s5 = smov 35  }
  0xbb   : > { %v448_v4 = vmul.f32 %v447_v0, %v2238_v51 }
  0xbc   : > { %1164 = vrot.lane.b32.xlu1 %v1077_v49, %s1943_s26  ;;  %s2245_s26 = sld [smem:[#allocation3 + $0x1c]] }
  0xbe   : > { %v449_v1 = vstv %s2236_s29  ;;  %s2277_s29 = sld [smem:[#allocation3 + $0x1]] }
  0xbf   : > { %v450_v5 = vmul.f32 %v449_v1, %v2240_v52 }
  0xc0   : > { %1184 = vrot.lane.b32.xlu1 %v1077_v49, %s1944_s28  ;;  %s2247_s28 = sld [smem:[#allocation3 + $0x4d]] }
  0xc1   : > { %v451_v17 = vadd.f32 %v450_v5, %v448_v4  ;;  %v749_v5 = vstv %s2310_s9  ;;  %s2366_s9 = sld [smem:[#allocation3 + $0x49]] }
  0xc2   : > { %v471_v13 = vstv %s2245_s26  ;;  %s2293_s26 = sld [smem:[#allocation3 + $0x8]] }
  0xc3   : > { %v472_v18 = vmul.f32 %v471_v13, %v2266_v8 }
  0xc4   : > { %1204 = vrot.lane.b32.xlu1 %v1077_v49, %s1945_s22  ;;  %s1948_s22 = smov 115   ;;  %v533_v41 = vstv %s2277_s29  ;;  %s2332_s29 = sld [smem:[#allocation3 + $0x1d]] }
  0xc5   : > { %v534_v49 = vmul.f32 %v533_v41, %v2238_v51 }
  0xc6   : > { %v473_v14 = vstv %s2247_s28  ;;  %s2295_s28 = sld [smem:[#allocation3 + $0x39]] }
  0xc7   : > { %v474_v19 = vmul.f32 %v473_v14, %v2268_v12 }
  0xc8   : > { %1227 = vrot.lane.b32.xlu1 %v2230_v50, %s1946_s10  ;;  %s1949_s10 = smov 3   ;;  %v554_v55 = vstv %s2293_s26  ;;  %s2340_s26 = sld [smem:[#allocation3 + $0xa]] }
  0xc9   : > { %v475_v30 = vadd.f32 %v474_v19, %v472_v18 }
  0xca   : > { %v614_v27 = vstv %s2332_s29  ;;  %s2417_s29 = sld [smem:[#allocation3 + $0x35]] }
  0xcc   : > { %1247 = vrot.lane.b32.xlu1 %v2230_v50, %s1947_s6  ;;  %s2262_s6 = sld [smem:[#allocation3 + $0x5b]]  ;;  %v556_v56 = vstv %s2295_s28  ;;  %s2353_s28 = sld [smem:[#allocation3 + $0x24]] }
  0xcd   : > { %v557_v62 = vmul.f32 %v556_v56, %v2240_v52  ;;  %v866_v56 = vstv %s2366_s9  ;;  %s2444_s9 = sld [smem:[#allocation3 + $0x43]] }
  0xce   : > { %v826_v31 = vstv %s2340_s26  ;;  %s2427_s26 = sld [smem:[#allocation3 + $0x9]] }
  0xd0   : > { %1267 = vrot.lane.b32.xlu1 %v2230_v50, %s1948_s22  ;;  %s2279_s22 = sld [smem:[#allocation3 + $0x32]] }
  0xd2   : > { %v513_v28 = vstv %s2262_s6  ;;  %s2328_s6 = sld [smem:[#allocation3 + $0x2c]] }
  0xd3   : > { %v514_v38 = vmul.f32 %v513_v28, %v2268_v12 }
  0xd4   : > { %1287 = vrot.lane.b32.xlu1 %v2230_v50, %s1949_s10  ;;  %s2302_s10 = sld [smem:[#allocation3 + $0x40]] }
  0xd5   : > { %v515_v53 = vadd.f32 %v514_v38, %v512_v37 }
  0xd6   : > { %v453_v59 = vpop.permute.xlu1 %452  ;;  %v413_v60 = vpop.permute.xlu0 %412  ;;  %v535_v43 = vstv %s2279_s22  ;;  %s2338_s22 = sld [smem:[#allocation3 + $0x4e]] }
  0xd7   : > { %v414_v2 = vrot.slane %v413_v60, 7  ;;  %v454_v11 = vrot.slane %v453_v59, 7 }
  0xd8   : > { %1307 = vrot.lane.b32.xlu1 %v2230_v50, %s1950_s20  ;;  %s2317_s20 = sld [smem:[#allocation3 + $0x47]] }
  0xd9   : > { %v416_v3 = vsel %vm2893_vm2, %v414_v2, %v413_v60  ;;  %v456_v23 = vsel %vm2895_vm4, %v454_v11, %v453_v59  ;;  %vm984_vm2 = vcmask 924672   ;;  %vm670_vm4 = vcmask 252928  }
  0xda   : > { %v418_v6 = vmul.f32 %v416_v3, %v411_v61  ;;  %v477_v7 = vpop.permute.xlu1 %476  ;;  %v433_v9 = vpop.permute.xlu0 %432  ;;  %v458_v29 = vmul.f32 %v456_v23, %v451_v17  ;;  %v555_v61 = vmul.f32 %v554_v55, %v2238_v51  ;;  %v576_v2 = vstv %s2302_s10  ;;  %s2364_s10 = sld [smem:[#allocation3 + $0x18]] }
  0xdb   : > { %v434_v15 = vrot.slane %v433_v9, 7  ;;  %v478_v24 = vrot.slane %v477_v7, 7  ;;  %v577_v14 = vmul.f32 %v576_v2, %v2240_v52  ;;  %v787_v23 = vstv %s2328_s6  ;;  %s2916_s6 = smov 111  }
  0xdc   : > { %1327 = vrot.lane.b32.xlu1 %v2230_v50, %s1951_s5  ;;  %420 = vrot.lane.b32.xlu0 %v418_v6, %s1928_s11  ;;  %s1952_s11 = smov 51   ;;  %s2330_s5 = sld [smem:[#allocation3 + $0x5d]]  ;;  %v558_v17 = vadd.f32 %v557_v62, %v555_v61 }
  0xdd   : > { %v436_v16 = vsel %vm2894_vm3, %v434_v15, %v433_v9  ;;  %v480_v35 = vsel %vm479_vm5, %v478_v24, %v477_v7  ;;  %v750_v15 = vmul.f32 %v749_v5, %v2266_v8  ;;  %vm610_vm5 = vcmask 646144  }
  0xde   : > { %v438_v20 = vmul.f32 %v436_v16, %v431_v10  ;;  %v517_v21 = vpop.permute.xlu1 %516  ;;  %v497_v22 = vpop.permute.xlu0 %496  ;;  %v482_v39 = vmul.f32 %v480_v35, %v475_v30  ;;  %v594_v10 = vstv %s2315_s18  ;;  %v596_v11 = vstv %s2317_s20  ;;  %s2394_s18 = sld [smem:[#allocation3 + $0x57]]  ;;  %s2400_s20 = sld [smem:[#allocation3 + $0x2]] }
  0xdf   : > { %v498_v36 = vrot.slane %v497_v22, 7  ;;  %v518_v46 = vrot.slane %v517_v21, 7  ;;  %v595_v25 = vmul.f32 %v594_v10, %v2238_v51  ;;  %v597_v26 = vmul.f32 %v596_v11, %v2240_v52 }
  0xe0   : > { %1347 = vrot.lane.b32.xlu1 %v2230_v50, %s1952_s11  ;;  %440 = vrot.lane.b32.xlu0 %v438_v20, %s1925_s21  ;;  %s2298_s21 = sld [smem:[#allocation3 + $0xf]]  ;;  %v536_v50 = vmul.f32 %v535_v43, %v2240_v52  ;;  %v788_v35 = vmul.f32 %v787_v23, %v2266_v8  ;;  %v864_v55 = vstv %s2364_s10  ;;  %s2438_s10 = sld [smem:[#allocation3 + $0x12]]  ;;  %vm1024_vm3 = vcmask 138240  }
  0xe1   : > { %v500_v48 = vsel %vm2891_vm6, %v498_v36, %v497_v22  ;;  %v520_v59 = vsel %vm2892_vm7, %v518_v46, %v517_v21  ;;  %v615_v46 = vmul.f32 %v614_v27, %v2266_v8  ;;  %vm527_vm6 = vcmask 261120  }
  0xe2   : > { %v2291_v33 = vpop.permute.xlu1 %559  ;;  %v540_v34 = vpop.permute.xlu0 %539  ;;  %v502_v54 = vmul.f32 %v500_v48, %v495_v40  ;;  %v537_v63 = vadd.f32 %v536_v50, %v534_v49  ;;  %v522_v1 = vmul.f32 %v520_v59, %v515_v53  ;;  %v789_v24 = vstv %s2330_s5  ;;  %v862_v50 = vld [vmem:[#allocation2 + $0x2] ss:$2 sm:$0x3]  ;;  %s2415_s5 = sld [smem:[#allocation3 + $0x4]] }
  0xe3   : > { %v541_v60 = vrot.slane %v540_v34, 7  ;;  %v561_v7 = vrot.slane %v2291_v33, 7  ;;  %v790_v36 = vmul.f32 %v789_v24, %v2268_v12  ;;  %v634_v40 = vstv %s2353_s28  ;;  %s2917_s28 = smov 95  }
  0xe4   : > { %460 = vrot.lane.b32.xlu0 %v458_v29, %s1926_s27  ;;  %s2312_s27 = sld [smem:[#allocation3 + $0x4f]]  ;;  %v616_v29 = vstv %s2338_s22  ;;  %v827_v49 = vmul.f32 %v826_v31, %v2238_v51  ;;  %v598_v59 = vadd.f32 %v597_v26, %v595_v25  ;;  %v635_v2 = vmul.f32 %v634_v40, %v2266_v8  ;;  %s2425_s22 = sld [smem:[#allocation3 + $0x10]] }
  0xe5   : > { %v543_v9 = vsel %vm2898_vm8, %v541_v60, %v540_v34  ;;  %v563_v21 = vsel %vm2899_vm9, %v561_v7, %v2291_v33  ;;  %v617_v48 = vmul.f32 %v616_v29, %v2268_v12  ;;  %v865_v10 = vmul.f32 %v864_v55, %v862_v50 }
  0xe6   : > { %v2306_v44 = vpop.permute.xlu1 %599  ;;  %v2308_v45 = vpop.permute.xlu0 %579  ;;  %v574_v0 = vstv %s2298_s21  ;;  %s2357_s21 = sld [smem:[#allocation3 + $0x55]]  ;;  %v545_v18 = vmul.f32 %v543_v9, %v537_v63  ;;  %v565_v32 = vmul.f32 %v563_v21, %v558_v17  ;;  %v791_v63 = vadd.f32 %v790_v36, %v788_v35 }
  0xe7   : > { %v575_v13 = vmul.f32 %v574_v0, %v2238_v51  ;;  %v581_v22 = vrot.slane %v2308_v45, 7  ;;  %v601_v38 = vrot.slane %v2306_v44, 7  ;;  %v618_v11 = vadd.f32 %v617_v48, %v615_v46 }
  0xe8   : > { %484 = vrot.lane.b32.xlu0 %v482_v39, %s1953_s23  ;;  %s2405_s23 = sld [smem:[#allocation3 + $0x33]]  ;;  %v899_v23 = vstv %s2394_s18  ;;  %v676_v26 = vstv %s2400_s20  ;;  %v935_v40 = vstv %s2415_s5  ;;  %s2462_s18 = sld [smem:[#allocation3 + $0x20]]  ;;  %vm944_vm7 = vcmask 662528  }
  0xe9   : > { %v578_v28 = vadd.f32 %v577_v14, %v575_v13  ;;  %v583_v39 = vsel %vm2900_vm11, %v581_v22, %v2308_v45  ;;  %v900_v35 = vmul.f32 %v899_v23, %v2268_v12  ;;  %v677_v46 = vmul.f32 %v676_v26, %v2238_v51  ;;  %s2468_s20 = sld [smem:[#allocation3 + $0x51]]  ;;  %s1955_s5 = smov 63  }
  0xea   : > { %v2323_v57 = vpop.permute.xlu1 %639  ;;  %v2325_v58 = vpop.permute.xlu0 %619  ;;  %v751_v6 = vstv %s2312_s27  ;;  %s2384_s27 = sld [smem:[#allocation3 + $0x5c]]  ;;  %v713_v50 = vstv %s2425_s22  ;;  %v936_v55 = vmul.f32 %v935_v40, %v2238_v51  ;;  %s2921_s22 = smov 77   ;;  %vm885_vm8 = vcmask 130048  }
  0xeb   : > { %v752_v16 = vmul.f32 %v751_v6, %v2268_v12  ;;  %v585_v60 = vmul.f32 %v583_v39, %v578_v28  ;;  %v621_v5 = vrot.slane %v2325_v58, 7  ;;  %v641_v24 = vrot.slane %v2323_v57, 7 }
  0xec   : > { %504 = vrot.lane.b32.xlu0 %v502_v54, %s1929_s4  ;;  %s2349_s4 = sld [smem:[#allocation3 + $0x3b]]  ;;  %v636_v43 = vstv %s2357_s21  ;;  %v863_v54 = vld [vmem:[#allocation2 + $0x3] ss:$2 sm:$0x3]  ;;  %s2431_s21 = sld [smem:[#allocation3 + $0x3a]]  ;;  %v714_v26 = vmul.f32 %v713_v50, %v2238_v51  ;;  %vm507_vm9 = vcmask 392192  }
  0xed   : > { %v753_v30 = vadd.f32 %v752_v16, %v750_v15  ;;  %v637_v7 = vmul.f32 %v636_v43, %v2268_v12  ;;  %v623_v25 = vsel %vm622_vm13, %v621_v5, %v2325_v58  ;;  %v643_v43 = vsel %vm2896_vm0, %v641_v24, %v2323_v57 }
  0xee   : > { %v2343_v3 = vpop.permute.xlu1 %682  ;;  %v2345_v4 = vpop.permute.xlu0 %659  ;;  %v678_v29 = vstv %s2405_s23  ;;  %v625_v36 = vmul.f32 %v623_v25, %v618_v11  ;;  %vm590_vm13 = vcmask 777216   ;;  %s2473_s23 = sld [smem:[#allocation3 + $0x17]]  ;;  %v978_v5 = vstv %s2444_s9  ;;  %s2515_s9 = sld [smem:[#allocation3 + $0x3]] }
  0xef   : > { %v638_v28 = vadd.f32 %v637_v7, %v635_v2  ;;  %v661_v48 = vrot.slane %v2345_v4, 7  ;;  %v1018_v25 = vstv %s2468_s20  ;;  %s1956_s20 = smov 124   ;;  %vm463_vm0 = vcmask 654336  }
  0xf0   : > { %524 = vrot.lane.b32.xlu0 %v522_v1, %s1930_s30  ;;  %s2380_s30 = sld [smem:[#allocation3 + $0x2b]]  ;;  %v603_v1 = vsel %vm602_vm10, %v601_v38, %v2306_v44  ;;  %v867_v44 = vmul.f32 %v866_v56, %v863_v54  ;;  %v656_v13 = vstv %s2384_s27  ;;  %s2918_s27 = smov 30   ;;  %vm1004_vm11 = vcmask 7168  }
  0xf1   : > { %v605_v16 = vmul.f32 %v603_v1, %v598_v59  ;;  %v657_v58 = vmul.f32 %v656_v13, %v2268_v12  ;;  %v645_v59 = vmul.f32 %v643_v43, %v638_v28  ;;  %v684_v1 = vrot.slane %v2343_v3, 7 }
  0xf2   : > { %v2368_v19 = vpop.permute.xlu1 %718  ;;  %v2370_v20 = vpop.permute.xlu0 %700  ;;  %v828_v37 = vstv %s2349_s4  ;;  %s1954_s4 = smov 62   ;;  %v868_v31 = vadd.f32 %v867_v44, %v865_v10  ;;  %v697_v54 = vstv %s2431_s21  ;;  %s2504_s21 = sld [smem:[#allocation3 + $0x2e]] }
  0xf3   : > { %v829_v53 = vmul.f32 %v828_v37, %v2240_v52  ;;  %v698_v10 = vmul.f32 %v697_v54, %v2240_v52  ;;  %v702_v23 = vrot.slane %v2370_v20, 7  ;;  %v720_v40 = vrot.slane %v2368_v19, 7 }
  0xf4   : > { %547 = vrot.lane.b32.xlu0 %v545_v18, %s1922_s25  ;;  %s2392_s25 = sld [smem:[#allocation3 + $0x26]]  ;;  %v869_v57 = vmul.f32 %v868_v31, %v2215_v47 }
  0xf5   : > { %v830_v15 = vadd.f32 %v829_v53, %v827_v49  ;;  %v679_v49 = vmul.f32 %v678_v29, %v2240_v52  ;;  %v731_v29 = vstv %s2473_s23  ;;  %s2925_s23 = smov 126  }
  0xf6   : > { %v755_v33 = vpop.permute.xlu1 %754  ;;  %v2387_v34 = vpop.permute.xlu0 %736  ;;  %v654_v9 = vstv %s2380_s30  ;;  %s2448_s30 = sld [smem:[#allocation3 + $0x41]] }
  0xf7   : > { %v756_v41 = vrot.slane %v755_v33, 7 }
  0xf8   : > { %567 = vrot.lane.b32.xlu0 %v565_v32, %s2916_s6  ;;  %s2920_s6 = smov 109  }
  0xf9   : > { %v758_v45 = vsel %vm757_vm12, %v756_v41, %v755_v33  ;;  %v937_v41 = vstv %s2417_s29  ;;  %vm2897_vm12 = vcmask 375808   ;;  %s2478_s29 = sld [smem:[#allocation3 + $0x48]] }
  0xfa   : > { %v760_v61 = vmul.f32 %v758_v45, %v753_v30  ;;  %v793_v62 = vpop.permute.xlu1 %792  ;;  %v2413_v0 = vpop.permute.xlu0 %774  ;;  %v897_v22 = vstv %s2392_s25  ;;  %v655_v30 = vmul.f32 %v654_v9, %v2266_v8  ;;  %s2919_s25 = smov 79   ;;  %v695_v45 = vstv %s2427_s26  ;;  %s2922_s26 = smov 47  }
  0xfb   : > { %v794_v6 = vrot.slane %v793_v62, 7  ;;  %v898_v33 = vmul.f32 %v897_v22, %v2266_v8  ;;  %v938_v56 = vmul.f32 %v937_v41, %v2240_v52  ;;  %v663_v47 = vsel %vm2897_vm12, %v661_v48, %v2345_v4 }
  0xfc   : > { %762 = vrot.lane.b32.xlu1 %v760_v61, %s1954_s4  ;;  %587 = vrot.lane.b32.xlu0 %v585_v60, %s2917_s28  ;;  %v658_v53 = vadd.f32 %v657_v58, %v655_v30  ;;  %v715_v7 = vstv %s2448_s30  ;;  %v696_v9 = vmul.f32 %v695_v45, %v2238_v51  ;;  %s2494_s4 = sld [smem:[#allocation3 + $0x25]]  ;;  %s2496_s28 = sld [smem:[#allocation3 + $0x56]]  ;;  %v685_v22 = vsel %vm610_vm5, %v684_v1, %v2343_v3 }
  0xfd   : > { %v795_v14 = vsel %vm650_vm14, %v794_v6, %v793_v62  ;;  %v901_v62 = vadd.f32 %v900_v35, %v898_v33  ;;  %v680_v6 = vadd.f32 %v679_v49, %v677_v46  ;;  %v939_v44 = vadd.f32 %v938_v56, %v936_v55  ;;  %s2923_s30 = smov 45  }
  0xfe   : > { %v797_v17 = vmul.f32 %v795_v14, %v791_v63  ;;  %v832_v18 = vpop.permute.xlu1 %831  ;;  %v2434_v21 = vpop.permute.xlu0 %813  ;;  %v976_v63 = vstv %s2438_s10  ;;  %v665_v13 = vmul.f32 %v663_v47, %v658_v53  ;;  %s2510_s10 = sld [smem:[#allocation3 + $0x5f]]  ;;  %v699_v28 = vadd.f32 %v698_v10, %v696_v9 }
  0xff   : > { %v833_v27 = vrot.slane %v832_v18, 7  ;;  %v977_v11 = vmul.f32 %v976_v63, %v2238_v51  ;;  %v733_v30 = vstv %s2478_s29  ;;  %v687_v58 = vmul.f32 %v685_v22, %v680_v6  ;;  %s2547_s29 = sld [smem:[#allocation3 + $0x3d]] }
 0x100   : > { %799 = vrot.lane.b32.xlu1 %v797_v17, %s2918_s27  ;;  %607 = vrot.lane.b32.xlu0 %v605_v16, %s2919_s25  ;;  %v979_v17 = vmul.f32 %v978_v5, %v2240_v52  ;;  %s2924_s27 = smov 31   ;;  %s2520_s25 = sld [smem:[#allocation3 + $0x34]]  ;;  %v703_v41 = vsel %vm590_vm13, %v702_v23, %v2370_v20  ;;  %v732_v48 = vmul.f32 %v731_v29, %v2238_v51  ;;  %v1056_v56 = vstv %s2504_s21 }
 0x101   : > { %v834_v32 = vsel %vm443_vm15, %v833_v27, %v832_v18  ;;  %v1016_v18 = vstv %s2462_s18  ;;  %v716_v27 = vmul.f32 %v715_v7, %v2240_v52  ;;  %v734_v49 = vmul.f32 %v733_v30, %v2240_v52  ;;  %s2532_s18 = sld [smem:[#allocation3 + $0x11]]  ;;  %s1958_s21 = smov 60  }
 0x102   : > { %v836_v37 = vmul.f32 %v834_v32, %v830_v15  ;;  %v2456_v38 = vpop.permute.xlu1 %882  ;;  %v2458_v39 = vpop.permute.xlu0 %849  ;;  %v1017_v31 = vmul.f32 %v1016_v18, %v2266_v8  ;;  %v769_v50 = vstv %s2494_s4  ;;  %v771_v45 = vstv %s2496_s28  ;;  %s1957_s4 = smov 92   ;;  %s2926_s28 = smov 110  }
 0x103   : > { %v717_v46 = vadd.f32 %v716_v27, %v714_v26  ;;  %v770_v1 = vmul.f32 %v769_v50, %v2266_v8  ;;  %v772_v47 = vmul.f32 %v771_v45, %v2268_v12  ;;  %v815_v27 = vrot.slane %v2434_v21, 7 }
 0x104   : > { %838 = vrot.lane.b32.xlu1 %v836_v37, %s2920_s6  ;;  %627 = vrot.lane.b32.xlu0 %v625_v36, %s1955_s5  ;;  %v980_v36 = vadd.f32 %v979_v17, %v977_v11  ;;  %v1019_v37 = vmul.f32 %v1018_v25, %v2268_v12  ;;  %s2537_s6 = sld [smem:[#allocation3 + $0x42]]  ;;  %s2541_s5 = sld [smem:[#allocation3 + $0xc]]  ;;  %v1058_v63 = vstv %s2510_s10  ;;  %vm423_vm12 = vcmask 916480  }
 0x105   : > { %s2927_s10 = smov 94   ;;  %v1101_v29 = vstv %s2547_s29  ;;  %s2606_s29 = sld [smem:[#allocation3 + $0x19]] }
 0x106   : > { %v2482_v60 = vpop.permute.xlu1 %920  ;;  %v903_v61 = vpop.permute.xlu0 %902  ;;  %v1020_v55 = vadd.f32 %v1019_v37, %v1017_v31  ;;  %v809_v5 = vstv %s2520_s25  ;;  %s2582_s25 = sld [smem:[#allocation3 + $0x4b]] }
 0x107   : > { %v904_v2 = vrot.slane %v903_v61, 7  ;;  %v810_v17 = vmul.f32 %v809_v5, %v2240_v52  ;;  %v844_v18 = vstv %s2532_s18  ;;  %s2586_s18 = sld [smem:[#allocation3 + $0xb]] }
 0x108   : > { %871 = vrot.lane.b32.xlu1 %v869_v57, %s2921_s22  ;;  %647 = vrot.lane.b32.xlu0 %v645_v59, %s2922_s26  ;;  %v705_v57 = vmul.f32 %v703_v41, %v699_v28  ;;  %s2551_s22 = sld [smem:[#allocation3 + $0x1f]]  ;;  %s2553_s26 = sld [smem:[#allocation3 + $0x50]]  ;;  %v1102_v41 = vmul.f32 %v1101_v29, %v2240_v52 }
 0x109   : > { %v905_v4 = vsel %vm527_vm6, %v904_v2, %v903_v61  ;;  %v738_v61 = vrot.slane %v2387_v34, 7  ;;  %v807_v2 = vstv %s2515_s9  ;;  %s2571_s9 = sld [smem:[#allocation3 + $0x2d]] }
 0x10a   : > { %v907_v14 = vmul.f32 %v905_v4, %v901_v62  ;;  %v2500_v15 = vpop.permute.xlu1 %961  ;;  %v942_v16 = vpop.permute.xlu0 %941  ;;  %v1057_v4 = vmul.f32 %v1056_v56, %v2266_v8  ;;  %v846_v22 = vstv %s2537_s6  ;;  %v1099_v25 = vstv %s2541_s5  ;;  %s1959_s6 = smov 28   ;;  %s2929_s5 = smov 46  }
 0x10b   : > { %v943_v24 = vrot.slane %v942_v16, 7 }
 0x10c   : > { %909 = vrot.lane.b32.xlu1 %v907_v14, %s2923_s30  ;;  %667 = vrot.lane.b32.xlu0 %v665_v13, %s2924_s27  ;;  %v776_v13 = vrot.slane %v2413_v0, 7  ;;  %v773_v14 = vadd.f32 %v772_v47, %v770_v1  ;;  %s2573_s30 = sld [smem:[#allocation3 + $0x5e]]  ;;  %s2576_s27 = sld [smem:[#allocation3 + $0x1a]] }
 0x10d   : > { %v945_v3 = vsel %vm944_vm7, %v943_v24, %v942_v16  ;;  %vm570_vm7 = vcmask 908288   ;;  %v808_v16 = vmul.f32 %v807_v2, %v2238_v51  ;;  %v956_v47 = vstv %s2586_s18  ;;  %s2645_s18 = sld [smem:[#allocation3 + $0x6]] }
 0x10e   : > { %v947_v32 = vmul.f32 %v945_v3, %v939_v44  ;;  %v2524_v33 = vpop.permute.xlu1 %1001  ;;  %v982_v35 = vpop.permute.xlu0 %981  ;;  %v721_v59 = vsel %vm570_vm7, %v720_v40, %v2368_v19  ;;  %v735_v19 = vadd.f32 %v734_v49, %v732_v48  ;;  %v1059_v44 = vmul.f32 %v1058_v63, %v2268_v12 }
 0x10f   : > { %v983_v43 = vrot.slane %v982_v35, 7  ;;  %v723_v7 = vmul.f32 %v721_v59, %v717_v46  ;;  %v777_v26 = vsel %vm670_vm4, %v776_v13, %v2413_v0  ;;  %v877_v30 = vstv %s2551_s22  ;;  %s2608_s22 = sld [smem:[#allocation3 + $0x4a]] }
 0x110   : > { %949 = vrot.lane.b32.xlu1 %v947_v32, %s1956_s20  ;;  %689 = vrot.lane.b32.xlu0 %v687_v58, %s2925_s23  ;;  %v1060_v24 = vadd.f32 %v1059_v44, %v1057_v4  ;;  %v879_v3 = vstv %s2553_s26  ;;  %s2928_s20 = smov 78   ;;  %v811_v31 = vadd.f32 %v810_v17, %v808_v16  ;;  %v845_v58 = vmul.f32 %v844_v18, %v2238_v51  ;;  %s2591_s23 = sld [smem:[#allocation3 + $0x3c]] }
 0x111   : > { %v985_v20 = vsel %vm984_vm2, %v983_v43, %v982_v35  ;;  %vm550_vm2 = vcmask 1039360   ;;  %v847_v32 = vmul.f32 %v846_v22, %v2240_v52  ;;  %v779_v35 = vmul.f32 %v777_v26, %v773_v14  ;;  %s2611_s26 = sld [smem:[#allocation3 + $0x28]] }
 0x112   : > { %v987_v53 = vmul.f32 %v985_v20, %v980_v36  ;;  %v1022_v54 = vpop.permute.xlu1 %1021  ;;  %v739_v11 = vsel %vm550_vm2, %v738_v61, %v2387_v34  ;;  %v1100_v40 = vmul.f32 %v1099_v25, %v2238_v51  ;;  %v816_v43 = vsel %vm463_vm0, %v815_v27, %v2434_v21 }
 0x113   : > { %v1023_v62 = vrot.slane %v1022_v54, 7  ;;  %v741_v34 = vmul.f32 %v739_v11, %v735_v19  ;;  %v851_v46 = vrot.slane %v2458_v39, 7  ;;  %v878_v48 = vmul.f32 %v877_v30, %v2266_v8 }
 0x114   : > { %989 = vrot.lane.b32.xlu1 %v987_v53, %s1957_s4  ;;  %707 = vrot.lane.b32.xlu0 %v705_v57, %s2926_s28  ;;  %v880_v49 = vmul.f32 %v879_v3, %v2268_v12  ;;  %v848_v50 = vadd.f32 %v847_v32, %v845_v58  ;;  %v915_v45 = vstv %s2571_s9  ;;  %v917_v20 = vstv %s2573_s30  ;;  %s2617_s4 = sld [smem:[#allocation3 + $0x59]]  ;;  %s2621_s28 = sld [smem:[#allocation3 + $0x27]] }
 0x115   : > { %v1025_v6 = vsel %vm1024_vm3, %v1023_v62, %v1022_v54  ;;  %vm1064_vm3 = vcmask 400384   ;;  %v818_v21 = vmul.f32 %v816_v43, %v811_v31  ;;  %v1103_v53 = vadd.f32 %v1102_v41, %v1100_v40  ;;  %s2635_s9 = sld [smem:[#allocation3 + $0x5]]  ;;  %s1960_s30 = smov 107  }
 0x116   : > { %v1027_v9 = vmul.f32 %v1025_v6, %v1020_v55  ;;  %v2559_v10 = vpop.permute.xlu1 %1041  ;;  %v1139_v54 = vstv %s2576_s27  ;;  %v884_v55 = vrot.slane %v2456_v38, 7  ;;  %v852_v56 = vsel %vm423_vm12, %v851_v46, %v2458_v39  ;;  %s2931_s27 = smov 93  }
 0x117   : > { %v1141_v61 = vstv %s2582_s25  ;;  %v916_v62 = vmul.f32 %v915_v45, %v2266_v8  ;;  %v918_v63 = vmul.f32 %v917_v20, %v2268_v12  ;;  %v881_v1 = vadd.f32 %v880_v49, %v878_v48  ;;  %s2642_s25 = sld [smem:[#allocation3 + $0x36]] }
 0x118   : > { %1029 = vrot.lane.b32.xlu1 %v1027_v9, %s1958_s21  ;;  %725 = vrot.lane.b32.xlu0 %v723_v7, %s2927_s10  ;;  %s2930_s21 = smov 125   ;;  %v958_v19 = vstv %s2591_s23  ;;  %s2626_s10 = sld [smem:[#allocation3 + $0x58]]  ;;  %v854_v2 = vmul.f32 %v852_v56, %v848_v50  ;;  %v1140_v7 = vmul.f32 %v1139_v54, %v2266_v8  ;;  %v1142_v9 = vmul.f32 %v1141_v61, %v2268_v12 }
 0x119   : > { %v886_v4 = vsel %vm885_vm8, %v884_v55, %v2456_v38  ;;  %v922_v44 = vrot.slane %v2482_v60, 7  ;;  %v919_v11 = vadd.f32 %v918_v63, %v916_v62  ;;  %v957_v13 = vmul.f32 %v956_v47, %v2238_v51  ;;  %s2655_s23 = sld [smem:[#allocation3 + $0x13]] }
 0x11a   : > { %v1062_v23 = vpop.permute.xlu1 %1061  ;;  %v959_v14 = vmul.f32 %v958_v19, %v2240_v52  ;;  %v996_v16 = vstv %s2606_s29  ;;  %v998_v17 = vstv %s2608_s22  ;;  %v888_v38 = vmul.f32 %v886_v4, %v881_v1  ;;  %s2669_s29 = sld [smem:[#allocation3 + $0x21]]  ;;  %s1962_s22 = smov 75   ;;  %v2698_v19 = vld [vmem:[#allocation2] ss:$2 sm:$0x7] }
 0x11b   : > { %v1063_v28 = vrot.slane %v1062_v23, 7  ;;  %vm1147_vm8 = vcmask 15360   ;;  %v1143_v22 = vadd.f32 %v1142_v9, %v1140_v7  ;;  %v1181_v26 = vstv %s2617_s4  ;;  %s2676_s4 = sld [smem:[#allocation3 + $0x52]] }
 0x11c   : > { %743 = vrot.lane.b32.xlu0 %v741_v34, %s2928_s20  ;;  %v1179_v34 = vstv %s2611_s26  ;;  %s2651_s20 = sld [smem:[#allocation3 + $0x37]]  ;;  %v997_v27 = vmul.f32 %v996_v16, %v2266_v8  ;;  %v960_v29 = vadd.f32 %v959_v14, %v957_v13  ;;  %v1036_v30 = vstv %s2621_s28  ;;  %s2932_s26 = smov 29  }
 0x11d   : > { %v1065_v0 = vsel %vm1064_vm3, %v1063_v28, %v1062_v23  ;;  %vm1107_vm3 = vcmask 801792   ;;  %v923_v23 = vsel %vm507_vm9, %v922_v44, %v2482_v60  ;;  %v999_v28 = vmul.f32 %v998_v17, %v2268_v12  ;;  %s2679_s28 = sld [smem:[#allocation3 + $0x14]] }
 0x11e   : > { %v1067_v36 = vmul.f32 %v1065_v0, %v1060_v24  ;;  %v2594_v37 = vpop.permute.xlu1 %1084  ;;  %v963_v24 = vrot.slane %v2500_v15, 7  ;;  %v1038_v3 = vstv %s2626_s10  ;;  %v925_v31 = vmul.f32 %v923_v23, %v919_v11  ;;  %s1963_s10 = smov 108  }
 0x11f   : > { %v1180_v0 = vmul.f32 %v1179_v34, %v2266_v8  ;;  %v1003_v40 = vrot.slane %v2524_v33, 7  ;;  %v1000_v41 = vadd.f32 %v999_v28, %v997_v27  ;;  %v1037_v43 = vmul.f32 %v1036_v30, %v2266_v8 }
 0x120   : > { %1069 = vrot.lane.b32.xlu1 %v1067_v36, %s1959_s6  ;;  %781 = vrot.lane.b32.xlu0 %v779_v35, %s2929_s5  ;;  %s1961_s6 = smov 61   ;;  %s2659_s5 = sld [smem:[#allocation3 + $0x44]]  ;;  %v1182_v35 = vmul.f32 %v1181_v26, %v2268_v12  ;;  %v1039_v46 = vmul.f32 %v1038_v3, %v2268_v12  ;;  %v1078_v48 = vstv %s2635_s9  ;;  %v1080_v49 = vstv %s2642_s25 }
 0x121   : > { %v1221_v20 = vstv %s2645_s18  ;;  %v1079_v55 = vmul.f32 %v1078_v48, %v2238_v51  ;;  %v1081_v56 = vmul.f32 %v1080_v49, %v2240_v52  ;;  %s2689_s9 = sld [smem:[#allocation3 + $0x2f]]  ;;  %v1119_v61 = vstv %s2655_s23  ;;  %v2701_v52 = vld [vmem:[#allocation2 + $0x1] ss:$2 sm:$0x7]  ;;  %s1965_s25 = smov 76  }
 0x122   : > { %v1105_v57 = vpop.permute.xlu1 %1104  ;;  %v1183_v45 = vadd.f32 %v1182_v35, %v1180_v0  ;;  %v1223_v54 = vstv %s2651_s20  ;;  %v1222_v51 = vmul.f32 %v2698_v19, %v1221_v20  ;;  %s2707_s18 = sld [smem:[#allocation3 + $0xd]]  ;;  %v1120_v9 = vmul.f32 %v2698_v19, %v1119_v61  ;;  %s2713_s20 = sld [smem:[#allocation3 + $0x3e]]  ;;  %v2743_v0 = vld [vmem:[#allocation2 + $0x3] ss:$2 sm:$0x7] }
 0x123   : > { %v1106_v59 = vrot.slane %v1105_v57, 7  ;;  %v1082_v7 = vadd.f32 %v1081_v56, %v1079_v55  ;;  %v1159_v44 = vstv %s2669_s29  ;;  %v1161_v11 = vstv %s2676_s4  ;;  %s2716_s23 = sld [smem:[#allocation3 + $0x22]]  ;;  %s2733_s29 = sld [smem:[#allocation3 + $0x1b]] }
 0x124   : > { %820 = vrot.lane.b32.xlu0 %v818_v21, %s2930_s21  ;;  %v1005_v21 = vsel %vm1004_vm11, %v1003_v40, %v2524_v33  ;;  %s2685_s21 = sld [smem:[#allocation3 + $0x45]]  ;;  %vm1087_vm11 = vcmask 670720   ;;  %v1262_v16 = vstv %s2679_s28  ;;  %v1160_v34 = vmul.f32 %v1159_v44, %v2266_v8  ;;  %s1968_s4 = smov 123  }
 0x125   : > { %v1108_v39 = vsel %vm1107_vm3, %v1106_v59, %v1105_v57  ;;  %vm964_vm3 = vcmask 793600   ;;  %v1043_v57 = vrot.slane %v2559_v10, 7  ;;  %v1040_v59 = vadd.f32 %v1039_v46, %v1037_v43  ;;  %s2748_s28 = sld [smem:[#allocation3 + $0x29]] }
 0x126   : > { %v1110_v5 = vmul.f32 %v1108_v39, %v1103_v53  ;;  %v2629_v6 = vpop.permute.xlu1 %1124  ;;  %v965_v36 = vsel %vm964_vm3, %v963_v24, %v2500_v15  ;;  %vm1044_vm3 = vcmask 269312   ;;  %v1121_v33 = vstv %s2659_s5  ;;  %s1966_s5 = smov 44  }
 0x127   : > { %v967_v15 = vmul.f32 %v965_v36, %v960_v29  ;;  %v1007_v63 = vmul.f32 %v1005_v21, %v1000_v41  ;;  %v1224_v39 = vmul.f32 %v2701_v52, %v1223_v54  ;;  %v1122_v4 = vmul.f32 %v2701_v52, %v1121_v33 }
 0x128   : > { %1112 = vrot.lane.b32.xlu1 %v1110_v5, %s1960_s30  ;;  %856 = vrot.lane.b32.xlu0 %v854_v2, %s2931_s27  ;;  %s2691_s30 = sld [smem:[#allocation3 + $0x60]]  ;;  %v1045_v2 = vsel %vm1044_vm3, %v1043_v57, %v2559_v10  ;;  %v1086_v5 = vrot.slane %v2594_v37, 7  ;;  %s1964_s27 = smov 43   ;;  %vm1127_vm3 = vcmask 932864   ;;  %v1162_v23 = vmul.f32 %v1161_v11, %v2268_v12 }
 0x129   : > { %v1047_v10 = vmul.f32 %v1045_v2, %v1040_v59  ;;  %v1225_v14 = vadd.f32 %v1224_v39, %v1222_v51  ;;  %v1123_v24 = vadd.f32 %v1122_v4, %v1120_v9  ;;  %v1242_v36 = vstv %s2707_s18  ;;  %s1972_s18 = smov 27  }
 0x12a   : > { %v1145_v18 = vpop.permute.xlu1 %1144  ;;  %v1088_v17 = vsel %vm1087_vm11, %v1086_v5, %v2594_v37  ;;  %v1263_v37 = vmul.f32 %v2698_v19, %v1262_v16  ;;  %vm1167_vm11 = vcmask 146432   ;;  %v1302_v46 = vstv %s2716_s23  ;;  %v2772_v5 = vpop.permute.xlu0 %399  ;;  %s1974_s23 = smov 106  }
 0x12b   : > { %v1146_v25 = vrot.slane %v1145_v18, 7  ;;  %v1090_v28 = vmul.f32 %v1088_v17, %v1082_v7  ;;  %v1282_v59 = vstv %s2733_s29  ;;  %v1322_v7 = vstv %s2748_s28  ;;  %s1977_s29 = smov 42   ;;  %s1601_s28 = sshll.u32 %s2020_s16, 5 }
 0x12c   : > { %890 = vrot.lane.b32.xlu0 %v888_v38, %s1961_s6  ;;  %s2718_s6 = sld [smem:[#allocation3 + $0x53]]  ;;  %v1126_v38 = vrot.slane %v2629_v6, 7  ;;  %s1376_s16 = scalar_lea.sflag [#allocation5], %s2174_s17 }
 0x12d   : > { %v1148_v60 = vsel %vm1147_vm8, %v1146_v25, %v1145_v18  ;;  %vm1187_vm8 = vcmask 277504   ;;  %v1199_v25 = vstv %s2689_s9  ;;  %s2759_s9 = sld [smem:[#allocation3 + $0x61]] }
 0x12e   : > { %v1150_v58 = vmul.f32 %v1148_v60, %v1143_v22  ;;  %v2662_v32 = vpop.permute.xlu1 %1164  ;;  %v1264_v22 = vstv %s2685_s21  ;;  %v1201_v26 = vstv %s2691_s30  ;;  %v1128_v8 = vsel %vm1127_vm3, %v1126_v38, %v2629_v6  ;;  %s2752_s21 = sld [smem:[#allocation3 + $0x5a]]  ;;  %s1969_s30 = smov 91  }
 0x12f   : > { %v1265_v3 = vmul.f32 %v2701_v52, %v1264_v22  ;;  %v1166_v12 = vrot.slane %v2662_v32, 7  ;;  %v1163_v60 = vadd.f32 %v1162_v23, %v1160_v34  ;;  %v1202_v35 = vmul.f32 %v2743_v0, %v1201_v26 }
 0x130   : > { %1152 = vrot.lane.b32.xlu1 %v1150_v58, %s1962_s22  ;;  %927 = vrot.lane.b32.xlu0 %v925_v31, %s2932_s26  ;;  %s2735_s22 = sld [smem:[#allocation3 + $0x4c]]  ;;  %v2740_v31 = vld [vmem:[#allocation2 + $0x2] ss:$2 sm:$0x7]  ;;  %s1967_s26 = smov 122   ;;  %v1244_v6 = vstv %s2713_s20  ;;  %v1130_v40 = vmul.f32 %v1128_v8, %v1123_v24  ;;  %vm1207_vm3 = vcmask 408576  }
 0x131   : > { %v1200_v58 = vmul.f32 %v2740_v31, %v1199_v25  ;;  %v1266_v43 = vadd.f32 %v1265_v3, %v1263_v37  ;;  %v1168_v49 = vsel %vm1167_vm11, %v1166_v12, %v2662_v32  ;;  %v1245_v20 = vmul.f32 %v2701_v52, %v1244_v6  ;;  %s1973_s20 = smov 58  }
 0x132   : > { %v1185_v50 = vpop.permute.xlu1 %1184  ;;  %v1304_v48 = vstv %s2718_s6  ;;  %v1170_v54 = vmul.f32 %v1168_v49, %v1163_v60  ;;  %vm1250_vm11 = vcmask 809984   ;;  %v1323_v17 = vmul.f32 %v2740_v31, %v1322_v7  ;;  %s1975_s6 = smov 74  }
 0x133   : > { %v1186_v53 = vrot.slane %v1185_v50, 7  ;;  %v1203_v21 = vadd.f32 %v1202_v35, %v1200_v58  ;;  %v1305_v32 = vmul.f32 %v2743_v0, %v1304_v48  ;;  %v401_v49 = vrot.slane %v2772_v5, 7 }
 0x134   : > { %969 = vrot.lane.b32.xlu0 %v967_v15, %s1963_s10  ;;  %s2754_s10 = sld [smem:[#allocation3 + $0x30]]  ;;  %v1324_v9 = vstv %s2752_s21 }
 0x135   : > { %v1188_v62 = vsel %vm1187_vm8, %v1186_v53, %v1185_v50  ;;  %vm1230_vm8 = vcmask 678912   ;;  %v1303_v53 = vmul.f32 %v2740_v31, %v1302_v46  ;;  %v1325_v38 = vmul.f32 %v2743_v0, %v1324_v9 }
 0x136   : > { %v1190_v1 = vmul.f32 %v1188_v62, %v1183_v45  ;;  %v2696_v47 = vpop.permute.xlu1 %1204  ;;  %v1243_v45 = vmul.f32 %v2698_v19, %v1242_v36  ;;  %v1284_v61 = vstv %s2735_s22  ;;  %s291_s22 = sld [smem:[#allocation3]] }
 0x137   : > { %v1206_v15 = vrot.slane %v2696_v47, 7  ;;  %v1285_v51 = vmul.f32 %v2743_v0, %v1284_v61  ;;  %v1306_v39 = vadd.f32 %v1305_v32, %v1303_v53 }
 0x138   : > { %1192 = vrot.lane.b32.xlu1 %v1190_v1, %s1964_s27  ;;  %1009 = vrot.lane.b32.xlu0 %v1007_v63, %s1965_s25  ;;  %v1246_v63 = vadd.f32 %v1245_v20, %v1243_v45  ;;  %s1970_s27 = smov 90   ;;  %s1971_s25 = smov 59   ;;  %v1283_v1 = vmul.f32 %v2740_v31, %v1282_v59 }
 0x139   : > { %v1208_v33 = vsel %vm1207_vm3, %v1206_v15, %v2696_v47  ;;  %vm1290_vm3 = vcmask 23552  }
 0x13a   : > { %v1228_v13 = vpop.permute.xlu1 %1227  ;;  %v1210_v2 = vmul.f32 %v1208_v33, %v1203_v21  ;;  %v1342_v4 = vstv %s2754_s10 }
 0x13b   : > { %v1229_v18 = vrot.slane %v1228_v13, 7  ;;  %v1343_v24 = vmul.f32 %v2740_v31, %v1342_v4 }
 0x13c   : > { %1049 = vrot.lane.b32.xlu0 %v1047_v10, %s1966_s5  ;;  %s1976_s5 = smov 26  }
 0x13d   : > { %v1231_v27 = vsel %vm1230_vm8, %v1229_v18, %v1228_v13  ;;  %vm1270_vm8 = vcmask 941056   ;;  %v1344_v13 = vstv %s2759_s9 }
 0x13e   : > { %v1233_v29 = vmul.f32 %v1231_v27, %v1225_v14  ;;  %v2729_v30 = vpop.permute.xlu1 %1247  ;;  %v1286_v14 = vadd.f32 %v1285_v51, %v1283_v1  ;;  %v1345_v25 = vmul.f32 %v2743_v0, %v1344_v13 }
 0x13f   : > { %v1249_v62 = vrot.slane %v2729_v30, 7 }
 0x140   : > { %1235 = vrot.lane.b32.xlu1 %v1233_v29, %s1967_s26  ;;  %1092 = vrot.lane.b32.xlu0 %v1090_v28, %s1968_s4  ;;  %v1326_v29 = vadd.f32 %v1325_v38, %v1323_v17  ;;  %v1346_v37 = vadd.f32 %v1345_v25, %v1343_v24  ;;  %s1545_s26 = sld [smem:[#allocation3 + $0x31]]  ;;  %s1496_s4 = sshll.u32 %s2174_s17, 1 }
 0x141   : > { %v1251_v44 = vsel %vm1250_vm11, %v1249_v62, %v2729_v30  ;;  %vm1330_vm11 = vcmask 285696   ;;  %s211_s21 = scalar_lea.vmem [#allocation10], %s1496_s4 }
 0x142   : > { %v1268_v41 = vpop.permute.xlu1 %1267  ;;  %v1253_v18 = vmul.f32 %v1251_v44, %v1246_v63  ;;  %s1390_s10 = sshll.u32 %s211_s21, 4  ;;  %s2822_s10 = int_to_ptr.vmem [resolvable:$true] %s1390_s10 }
 0x143   : > { %v1269_v50 = vrot.slane %v1268_v41, 7 }
 0x144   : > { %1132 = vrot.lane.b32.xlu0 %v1130_v40, %s1969_s30  ;;  %v393_v40 = vstv %s291_s22 }
 0x145   : > { %v1271_v57 = vsel %vm1270_vm8, %v1269_v50, %v1268_v41  ;;  %vm1310_vm8 = vcmask 154624   ;;  %v394_v46 = vmul.f32 %v2698_v19, %v393_v40 }
 0x146   : > { %v1273_v55 = vmul.f32 %v1271_v57, %v1266_v43  ;;  %v1288_v56 = vpop.permute.xlu1 %1287  ;;  %v395_v41 = vstv %s1545_s26 }
 0x147   : > { %v1289_v11 = vrot.slane %v1288_v56, 7  ;;  %v396_v48 = vmul.f32 %v2701_v52, %v395_v41 }
 0x148   : > { %1275 = vrot.lane.b32.xlu1 %v1273_v55, %s1970_s27  ;;  %1172 = vrot.lane.b32.xlu0 %v1170_v54, %s1971_s25  ;;  %s2820_s27 = scalar_lea.hbm %s2870_s3, %s1601_s28  ;;  %s1978_s25 = smov [#allocation10]  }
 0x149   : > { %v1291_v26 = vsel %vm1290_vm3, %v1289_v11, %v1288_v56  ;;  %vm402_vm3 = vcmask 629760   ;;  %v397_v45 = vadd.f32 %v396_v48, %v394_v46 }
 0x14a   : > { %v1308_v47 = vpop.permute.xlu1 %1307  ;;  %v1293_v28 = vmul.f32 %v1291_v26, %v1286_v14  ;;  %v403_v20 = vsel %vm402_vm3, %v401_v49, %v2772_v5 }
 0x14b   : > { %v1309_v10 = vrot.slane %v1308_v47, 7  ;;  %v405_v54 = vmul.f32 %v403_v20, %v397_v45 }
 0x14c   : > { %1212 = vrot.lane.b32.xlu0 %v1210_v2, %s1972_s18  ;;  %s1828_s18 = sshll.u32 %s1978_s25, 4  ;;  %s1829_s18 = int_to_ptr.vmem [resolvable:$false] %s1828_s18 }
 0x14d   : > { %v1311_v16 = vsel %vm1310_vm8, %v1309_v10, %v1308_v47  ;;  %vm1350_vm8 = vcmask 416768   ;;  %p1831_p12 = scmp.lt.s32.totalorder %s2822_s10, %s1829_s18 }
 0x14e   : > { %v1313_v22 = vmul.f32 %v1311_v16, %v1306_v39  ;;  %v1328_v34 = vpop.permute.xlu1 %1327  ;;  %v421_v23 = vpop.permute.xlu0 %420 }
 0x14f   : > { %v1329_v27 = vrot.slane %v1328_v34, 7  ;;  %v422_v50 = vrot.slane %v421_v23, 1 }
 0x150   : > { %1315 = vrot.lane.b32.xlu1 %v1313_v22, %s1973_s20  ;;  %1255 = vrot.lane.b32.xlu0 %v1253_v18, %s1974_s23  ;;  %s1830_s20 = scalar_lea.vmem %s1829_s18, 64 }
 0x151   : > { %v1331_v8 = vsel %vm1330_vm11, %v1329_v27, %v1328_v34  ;;  %v424_v53 = vsel %vm423_vm12, %v421_v23, %v422_v50  ;;  %vm487_vm11 = vcmask 523264   ;;  %vm2939_vm12 = vcmask 891904  }
 0x152   : > { %v1348_v30 = vpop.permute.xlu1 %1347  ;;  %v441_v3 = vpop.permute.xlu0 %440  ;;  %v1333_v31 = vmul.f32 %v1331_v8, %v1326_v29  ;;  %v426_v56 = vadd.f32 %v424_v53, %v405_v54 }
 0x153   : > { %v1349_v12 = vrot.slane %v1348_v30, 7  ;;  %v442_v21 = vrot.slane %v441_v3, 1 }
 0x154   : > { %1295 = vrot.lane.b32.xlu0 %v1293_v28, %s1975_s6 }
 0x155   : > { %v1351_v60 = vsel %vm1350_vm8, %v1349_v12, %v1348_v30  ;;  %v444_v55 = vsel %vm443_vm15, %v441_v3, %v442_v21  ;;  %vm2934_vm15 = vcmask 769024  }
 0x156   : > { %v1353_v58 = vmul.f32 %v1351_v60, %v1346_v37  ;;  %v461_v0 = vpop.permute.xlu0 %460  ;;  %v446_v33 = vadd.f32 %v444_v55, %v426_v56 }
 0x157   : > { %v462_v32 = vrot.slane %v461_v0, 1 }
 0x158   : > { %1355 = vrot.lane.b32.xlu1 %v1353_v58, %s1976_s5  ;;  %1335 = vrot.lane.b32.xlu0 %v1333_v31, %s1977_s29 }
 0x159   : > { %v464_v59 = vsel %vm463_vm0, %v461_v0, %v462_v32  ;;  %vm2937_vm0 = vcmask 244736  }
 0x15a   : > { %v485_v35 = vpop.permute.xlu0 %484  ;;  %v466_v1 = vadd.f32 %v464_v59, %v446_v33 }
 0x15b   : > { %v486_v19 = vrot.slane %v485_v35, 7 }
 0x15d   : > { %v488_v62 = vsel %vm487_vm11, %v486_v19, %v485_v35  ;;  %vm952_vm11 = vcmask 1014784  }
 0x15e   : > { %v505_v36 = vpop.permute.xlu0 %504  ;;  %v490_v5 = vadd.f32 %v488_v62, %v466_v1 }
 0x15f   : > { %v506_v61 = vrot.slane %v505_v36, 7 }
 0x161   : > { %v508_v39 = vsel %vm507_vm9, %v506_v61, %v505_v36  ;;  %vm630_vm9 = vcmask 515072  }
 0x162   : > { %v525_v6 = vpop.permute.xlu0 %524  ;;  %v510_v9 = vadd.f32 %v508_v39, %v490_v5 }
 0x163   : > { %v526_v63 = vrot.slane %v525_v6, 7 }
 0x165   : > { %v528_v47 = vsel %vm527_vm6, %v526_v63, %v525_v6  ;;  %vm2933_vm6 = vcmask 900096  }
 0x166   : > { %v548_v43 = vpop.permute.xlu0 %547  ;;  %v530_v10 = vadd.f32 %v528_v47, %v510_v9 }
 0x167   : > { %v549_v2 = vrot.slane %v548_v43, 1 }
 0x169   : > { %v551_v44 = vsel %vm550_vm2, %v548_v43, %v549_v2  ;;  %vm2941_vm2 = vcmask 367616  }
 0x16a   : > { %v568_v15 = vpop.permute.xlu0 %567  ;;  %v553_v16 = vadd.f32 %v551_v44, %v530_v10 }
 0x16b   : > { %v569_v7 = vrot.slane %v568_v15, 1 }
 0x16d   : > { %v571_v13 = vsel %vm570_vm7, %v568_v15, %v569_v7  ;;  %vm893_vm7 = vcmask 498688  }
 0x16e   : > { %v588_v57 = vpop.permute.xlu0 %587  ;;  %v763_v17 = vpop.permute.xlu1 %762  ;;  %v573_v34 = vadd.f32 %v571_v13, %v553_v16 }
 0x16f   : > { %v589_v11 = vrot.slane %v588_v57, 1  ;;  %v764_v15 = vrot.slane %v763_v17, 7 }
 0x171   : > { %v591_v18 = vsel %vm590_vm13, %v588_v57, %v589_v11  ;;  %vm2940_vm13 = vcmask 760832  }
 0x172   : > { %v608_v52 = vpop.permute.xlu0 %607  ;;  %v593_v25 = vadd.f32 %v591_v18, %v573_v34  ;;  %v800_v29 = vpop.permute.xlu1 %799 }
 0x173   : > { %v609_v14 = vrot.slane %v608_v52, 1  ;;  %v801_v54 = vrot.slane %v800_v29, 7 }
 0x175   : > { %v611_v23 = vsel %vm610_vm5, %v608_v52, %v609_v14  ;;  %v802_v33 = vsel %vm2937_vm0, %v801_v54, %v800_v29  ;;  %vm2938_vm5 = vcmask 1022976   ;;  %vm1095_vm0 = vcmask 1006592  }
 0x176   : > { %v628_v51 = vpop.permute.xlu0 %627  ;;  %v613_v30 = vadd.f32 %v611_v23, %v593_v25  ;;  %v839_v35 = vpop.permute.xlu1 %838 }
 0x177   : > { %v629_v22 = vrot.slane %v628_v51, 7  ;;  %v840_v62 = vrot.slane %v839_v35, 1 }
 0x179   : > { %v631_v27 = vsel %vm630_vm9, %v629_v22, %v628_v51  ;;  %v841_v5 = vsel %vm2939_vm12, %v839_v35, %v840_v62  ;;  %vm2942_vm9 = vcmask 236544   ;;  %vm1135_vm12 = vcmask 744448  }
 0x17a   : > { %v648_v4 = vpop.permute.xlu0 %647  ;;  %v633_v8 = vadd.f32 %v631_v27, %v613_v30  ;;  %v872_v45 = vpop.permute.xlu1 %871 }
 0x17b   : > { %v649_v24 = vrot.slane %v648_v4, 7  ;;  %v873_v47 = vrot.slane %v872_v45, 7 }
 0x17d   : > { %v651_v37 = vsel %vm650_vm14, %v649_v24, %v648_v4  ;;  %vm765_vm14 = vcmask 506880   ;;  %v874_v13 = vsel %vm402_vm3, %v873_v47, %v872_v45  ;;  %vm992_vm3 = vcmask 752640  }
 0x17e   : > { %v668_v38 = vpop.permute.xlu0 %667  ;;  %v653_v58 = vadd.f32 %v651_v37, %v633_v8  ;;  %v766_v32 = vsel %vm765_vm14, %v764_v15, %v763_v17  ;;  %v910_v52 = vpop.permute.xlu1 %909  ;;  %vm1032_vm14 = vcmask 490496  }
 0x17f   : > { %v669_v28 = vrot.slane %v668_v38, 7  ;;  %v911_v14 = vrot.slane %v910_v52, 7 }
 0x181   : > { %v671_v60 = vsel %vm670_vm4, %v669_v28, %v668_v38  ;;  %vm2935_vm4 = vcmask 637952   ;;  %v912_v23 = vsel %vm2941_vm2, %v911_v14, %v910_v52  ;;  %vm1195_vm2 = vcmask 351232  }
 0x182   : > { %v690_v26 = vpop.permute.xlu0 %689  ;;  %v673_v36 = vadd.f32 %v671_v60, %v653_v58  ;;  %v950_v9 = vpop.permute.xlu1 %949 }
 0x183   : > { %v691_v3 = vrot.slane %v690_v26, 1  ;;  %v951_v24 = vrot.slane %v950_v9, 1 }
 0x185   : > { %v692_v0 = vsel %vm602_vm10, %v690_v26, %v691_v3  ;;  %vm2936_vm10 = vcmask 375808   ;;  %v953_v30 = vsel %vm952_vm11, %v950_v9, %v951_v24  ;;  %vm1215_vm11 = vcmask 220160  }
 0x186   : > { %v708_v12 = vpop.permute.xlu0 %707  ;;  %v694_v43 = vadd.f32 %v692_v0, %v673_v36  ;;  %v990_v18 = vpop.permute.xlu1 %989 }
 0x187   : > { %v709_v31 = vrot.slane %v708_v12, 1  ;;  %v991_v37 = vrot.slane %v990_v18, 1 }
 0x189   : > { %v710_v40 = vsel %vm2933_vm6, %v708_v12, %v709_v31  ;;  %vm972_vm6 = vcmask 883712   ;;  %v993_v0 = vsel %vm992_vm3, %v990_v18, %v991_v37  ;;  %vm1278_vm3 = vcmask 736256  }
 0x18a   : > { %v726_v6 = vpop.permute.xlu0 %725  ;;  %v712_v48 = vadd.f32 %v710_v40, %v694_v43  ;;  %v1030_v8 = vpop.permute.xlu1 %1029 }
 0x18b   : > { %v727_v41 = vrot.slane %v726_v6, 1  ;;  %v1031_v35 = vrot.slane %v1030_v8, 7 }
 0x18d   : > { %v728_v46 = vsel %vm2934_vm15, %v726_v6, %v727_v41  ;;  %vm1012_vm15 = vcmask 621568  }
 0x18e   : > { %v744_v49 = vpop.permute.xlu0 %743  ;;  %v730_v20 = vadd.f32 %v728_v46, %v712_v48  ;;  %v1033_v48 = vsel %vm1032_vm14, %v1031_v35, %v1030_v8  ;;  %vm1318_vm14 = vcmask 474112  }
 0x18f   : > { %v745_v50 = vrot.slane %v744_v49, 1 }
 0x191   : > { %v746_v21 = vsel %vm2935_vm4, %v744_v49, %v745_v50  ;;  %vm1052_vm4 = vcmask 359424  }
 0x192   : > { %v748_v57 = vadd.f32 %v746_v21, %v730_v20  ;;  %v782_v53 = vpop.permute.xlu0 %781  ;;  %v1070_v6 = vpop.permute.xlu1 %1069 }
 0x193   : > { %v783_v55 = vrot.slane %v782_v53, 7  ;;  %v1071_v49 = vrot.slane %v1070_v6, 7 }
 0x194   : > { %v768_v19 = vadd.f32 %v766_v32, %v748_v57 }
 0x195   : > { %v784_v56 = vsel %vm2936_vm10, %v783_v55, %v782_v53  ;;  %vm1072_vm10 = vcmask 228352  }
 0x196   : > { %v786_v59 = vadd.f32 %v784_v56, %v768_v19  ;;  %v821_v61 = vpop.permute.xlu0 %820  ;;  %v1073_v53 = vsel %vm1072_vm10, %v1071_v49, %v1070_v6  ;;  %vm1358_vm10 = vcmask 211968  }
 0x197   : > { %v822_v63 = vrot.slane %v821_v61, 1 }
 0x198   : > { %v804_v1 = vadd.f32 %v802_v33, %v786_v59 }
 0x199   : > { %v823_v51 = vsel %vm2938_vm5, %v821_v61, %v822_v63  ;;  %vm1115_vm5 = vcmask 875520  }
 0x19a   : > { %v825_v39 = vadd.f32 %v823_v51, %v804_v1  ;;  %v857_v2 = vpop.permute.xlu0 %856  ;;  %v1113_v50 = vpop.permute.xlu1 %1112 }
 0x19b   : > { %v858_v7 = vrot.slane %v857_v2, 1  ;;  %v1114_v32 = vrot.slane %v1113_v50, 1 }
 0x19c   : > { %v843_v4 = vadd.f32 %v841_v5, %v825_v39 }
 0x19d   : > { %v859_v44 = vsel %vm2940_vm13, %v857_v2, %v858_v7  ;;  %v1116_v61 = vsel %vm1115_vm5, %v1113_v50, %v1114_v32  ;;  %vm1155_vm13 = vcmask 613376  }
 0x19e   : > { %v861_v11 = vadd.f32 %v859_v44, %v843_v4  ;;  %v891_v10 = vpop.permute.xlu0 %890 }
 0x19f   : > { %v892_v16 = vrot.slane %v891_v10, 7 }
 0x1a0   : > { %v876_v17 = vadd.f32 %v874_v13, %v861_v11 }
 0x1a1   : > { %v894_v38 = vsel %vm893_vm7, %v892_v16, %v891_v10  ;;  %vm1175_vm7 = vcmask 482304  }
 0x1a2   : > { %v896_v22 = vadd.f32 %v894_v38, %v876_v17  ;;  %v928_v34 = vpop.permute.xlu0 %927  ;;  %v1153_v55 = vpop.permute.xlu1 %1152 }
 0x1a3   : > { %v929_v25 = vrot.slane %v928_v34, 7  ;;  %v1154_v33 = vrot.slane %v1153_v55, 7 }
 0x1a4   : > { %v914_v26 = vadd.f32 %v912_v23, %v896_v22 }
 0x1a5   : > { %v930_v27 = vsel %vm2942_vm9, %v929_v25, %v928_v34  ;;  %v1156_v5 = vsel %vm1155_vm13, %v1154_v33, %v1153_v55  ;;  %vm1238_vm9 = vcmask 998400  }
 0x1a6   : > { %v932_v28 = vadd.f32 %v930_v27, %v914_v26  ;;  %v970_v29 = vpop.permute.xlu0 %969 }
 0x1a7   : > { %v971_v3 = vrot.slane %v970_v29, 1 }
 0x1a8   : > { %v955_v12 = vadd.f32 %v953_v30, %v932_v28 }
 0x1a9   : > { %v973_v60 = vsel %vm972_vm6, %v970_v29, %v971_v3  ;;  %vm1258_vm6 = vcmask 867328  }
 0x1aa   : > { %v975_v31 = vadd.f32 %v973_v60, %v955_v12  ;;  %v1010_v58 = vpop.permute.xlu0 %1009  ;;  %v1193_v63 = vpop.permute.xlu1 %1192 }
 0x1ab   : > { %v1011_v36 = vrot.slane %v1010_v58, 7  ;;  %v1194_v47 = vrot.slane %v1193_v63, 7 }
 0x1ac   : > { %v995_v40 = vadd.f32 %v993_v0, %v975_v31 }
 0x1ad   : > { %v1013_v41 = vsel %vm1012_vm15, %v1011_v36, %v1010_v58  ;;  %v1196_v13 = vsel %vm1195_vm2, %v1194_v47, %v1193_v63  ;;  %vm1298_vm15 = vcmask 605184  }
 0x1ae   : > { %v1015_v43 = vadd.f32 %v1013_v41, %v995_v40  ;;  %v1050_v46 = vpop.permute.xlu0 %1049 }
 0x1af   : > { %v1051_v15 = vrot.slane %v1050_v46, 7 }
 0x1b0   : > { %v1035_v45 = vadd.f32 %v1033_v48, %v1015_v43 }
 0x1b1   : > { %v1053_v20 = vsel %vm1052_vm4, %v1051_v15, %v1050_v46  ;;  %vm1338_vm4 = vcmask 343040  }
 0x1b2   : > { %v1055_v21 = vadd.f32 %v1053_v20, %v1035_v45  ;;  %v1093_v57 = vpop.permute.xlu0 %1092  ;;  %v1236_v9 = vpop.permute.xlu1 %1235 }
 0x1b3   : > { %v1094_v54 = vrot.slane %v1093_v57, 1  ;;  %v1237_v14 = vrot.slane %v1236_v9, 1 }
 0x1b4   : > { %v1075_v19 = vadd.f32 %v1073_v53, %v1055_v21 }
 0x1b5   : > { %v1096_v56 = vsel %vm1095_vm0, %v1093_v57, %v1094_v54  ;;  %v1239_v23 = vsel %vm1238_vm9, %v1236_v9, %v1237_v14 }
 0x1b6   : > { %v1098_v52 = vadd.f32 %v1096_v56, %v1075_v19  ;;  %v1133_v59 = vpop.permute.xlu0 %1132 }
 0x1b7   : > { %v1134_v62 = vrot.slane %v1133_v59, 1 }
 0x1b8   : > { %v1118_v1 = vadd.f32 %v1116_v61, %v1098_v52 }
 0x1b9   : > { %v1136_v51 = vsel %vm1135_vm12, %v1133_v59, %v1134_v62 }
 0x1ba   : > { %v1138_v39 = vadd.f32 %v1136_v51, %v1118_v1  ;;  %v1173_v2 = vpop.permute.xlu0 %1172  ;;  %v1276_v17 = vpop.permute.xlu1 %1275 }
 0x1bb   : > { %v1174_v7 = vrot.slane %v1173_v2, 7  ;;  %v1277_v24 = vrot.slane %v1276_v17, 1 }
 0x1bc   : > { %v1158_v4 = vadd.f32 %v1156_v5, %v1138_v39 }
 0x1bd   : > { %v1176_v44 = vsel %vm1175_vm7, %v1174_v7, %v1173_v2  ;;  %v1279_v37 = vsel %vm1278_vm3, %v1276_v17, %v1277_v24 }
 0x1be   : > { %v1178_v11 = vadd.f32 %v1176_v44, %v1158_v4  ;;  %v1213_v10 = vpop.permute.xlu0 %1212 }
 0x1bf   : > { %v1214_v16 = vrot.slane %v1213_v10, 7 }
 0x1c0   : > { %v1198_v38 = vadd.f32 %v1196_v13, %v1178_v11 }
 0x1c1   : > { %v1216_v18 = vsel %vm1215_vm11, %v1214_v16, %v1213_v10 }
 0x1c2   : > { %v1218_v22 = vadd.f32 %v1216_v18, %v1198_v38  ;;  %v1256_v34 = vpop.permute.xlu0 %1255  ;;  %v1316_v26 = vpop.permute.xlu1 %1315 }
 0x1c3   : > { %v1257_v25 = vrot.slane %v1256_v34, 1  ;;  %v1317_v3 = vrot.slane %v1316_v26, 7 }
 0x1c4   : > { %v1241_v27 = vadd.f32 %v1239_v23, %v1218_v22 }
 0x1c5   : > { %v1259_v28 = vsel %vm1258_vm6, %v1256_v34, %v1257_v25  ;;  %v1319_v35 = vsel %vm1318_vm14, %v1317_v3, %v1316_v26 }
 0x1c6   : > { %v1261_v29 = vadd.f32 %v1259_v28, %v1241_v27  ;;  %v1296_v30 = vpop.permute.xlu0 %1295 }
 0x1c7   : > { %v1297_v8 = vrot.slane %v1296_v30, 7 }
 0x1c8   : > { %v1281_v12 = vadd.f32 %v1279_v37, %v1261_v29 }
 0x1c9   : > { %v1299_v60 = vsel %vm1298_vm15, %v1297_v8, %v1296_v30 }
 0x1ca   : > { %v1301_v31 = vadd.f32 %v1299_v60, %v1281_v12  ;;  %v1356_v58 = vpop.permute.xlu1 %1355  ;;  %v1336_v0 = vpop.permute.xlu0 %1335 }
 0x1cb   : > { %v1357_v36 = vrot.slane %v1356_v58, 7  ;;  %v1337_v6 = vrot.slane %v1336_v0, 7 }
 0x1cc   : > { %v1321_v40 = vadd.f32 %v1319_v35, %v1301_v31 }
 0x1cd   : > { %v1339_v41 = vsel %vm1338_vm4, %v1337_v6, %v1336_v0  ;;  %v1359_v46 = vsel %vm1358_vm10, %v1357_v36, %v1356_v58 }
 0x1ce   : > { %v1341_v43 = vadd.f32 %v1339_v41, %v1321_v40 }
 0x1d0   : > { %v1361_v48 = vadd.f32 %v1359_v46, %v1341_v43 }
 0x1d2   : > { %v1594_v49 = vmul.f32 -1.442695, %v1361_v48 }
 0x1d4   : > { %1745 = vpow2.f32 %v1594_v49 }
 0x1de   : > { %v1746_v15 = vpop.eup %1745 }
 0x1df   : > { %v1365_v50 = vadd.f32 1.0, %v1746_v15 }
 0x1e1   : > { %1747 = vrcp.f32 %v1365_v50 }
 0x1eb   : > { %v1748_v45 = vpop.eup %1747 }
 0x1ec   : > { %1369 = vrot.lane.b32.xlu0 %v1748_v45, %s1952_s11  ;;  %s1824_s11 = scalar_lea.vmem %s2822_s10, 32 }
 0x1ed   : > { %p1825_p11 = scmp.ne.s32.totalorder %s2822_s10, %s1824_s11  ;;  %p1832_p7 = scmp.lt.s32.totalorder %s1830_s20, %s1824_s11 }
 0x1ef   : > { %p1826_p6 = pnand %p1825_p11, %p2943_p4  ;;  %p1833_p13 = por %p1832_p7, %p1831_p12 }
 0x1f1   : > { %p1827_p9 = pneg %p1826_p6 }
 0x1f3   : > { %p1834_p3 = pnand %p1833_p13, %p1827_p9 }
 0x25e   : > { %v1370_v20 = vpop.permute.xlu0 %1369 }
 0x25f   : > { %v1371_v21 = vrot.slane %v1370_v20, 1 }
 0x261   : > { %v1372_v57 = vsel %vm1350_vm8, %v1370_v20, %v1371_v21 }
 0x262   : > { %1374 = vst.msk [vmem:[%s211_s21] sm:$0x3] %vm2200_vm1, %v1372_v57 }
 0x263   : > { %1837 = shalt.err (!%p1834_p3)
}
 0x264   : > { %s1838_s17 = scalar_lea.hbm %s2820_s27, 32  ;;  %s1842_s5 = scalar_lea.hbm %s2870_s3, 64 }
 0x265   : > { %p1839_p1 = scmp.ne.s32.totalorder %s2820_s27, %s1838_s17  ;;  %p1843_p2 = scmp.lt.u32.totalorder %s2820_s27, %s2870_s3 }
 0x266   : > { %p1844_p0 = scmp.lt.u32.totalorder %s1842_s5, %s1838_s17  ;;  %p1846_p11 = scmp.lt.u32.totalorder %s1838_s17, %s2820_s27 }
 0x267   : > { %p1840_p5 = pnand %p1839_p1, %p2943_p4 }
 0x268   : > { %p1845_p8 = por %p1844_p0, %p1843_p2 }
 0x269   : > { %p1841_p10 = pneg %p1840_p5 }
 0x26a   : > { %p1847_p6 = por %p1846_p11, %p1845_p8 }
 0x26c   : > { %p1848_p9 = pnand %p1847_p6, %p1841_p10 }
 0x26e   : > { %1851 = shalt.err (!%p1848_p9)
}
 0x26f   : > { %1612 = dma.vmem_to_hbm [thread:$0]  (%p2943_p4), %s2822_s10, 32, %s2820_s27, %s1376_s16  }
 0x270 PF: > { %s1402_s26 = sand.u32 1, %s1886_s12   ;;  %p2944_p12 = scmp.ne.s32.totalorder %s2902_s19, 0 }
 0x271   : > { %p2945_p7 = scmp.ge.s32.totalorder %s1898_s15, 2  ;;  %s1403_s4 = scalar_lea.sflag [#allocation5], %s1402_s26 }
 0x273   : > { %p1626_p13 = pnand %p2945_p7, %p2944_p12 }
 0x275   : > { %1881 = dma.done.wait (!%p1626_p13), %s1403_s4, 32  }
 0x276   : > { %1883 = vsyncadd (!%p1626_p13), %s1403_s4, 4294967264  ;;  %p18_p3 = scmp.ge.s32.totalorder %s2055_s24, 4   ;;  %s2946_s12 = smov %s1890_s13 }
 0x277   : > { %s2947_s13 = smov %s1894_s14  ;;  %s2948_s14 = smov %s2113_s7 }
 0x278   : > { %s2949_s15 = smov %s2055_s24  ;;  %20 = sbr.rel (!%p18_p3) target bundleno = 7 (0x7), region = 98 }
 0x27f   :  { %1408 = vsyncpa [#allocation4], 1 }
 0x280   :  { %1410 = vsyncpa [#allocation4 + $0x1], 1 }
 0x281   :  { %1411 = vsyncpa [#allocation9], 1 }
 0x282   :  { %1413 = vsyncpa [#allocation9 + $0x1], 1 }
 0x283   :  { %1414 = vsyncpa [#allocation5], 1 }
 0x284   :  { %1416 = vsyncpa [#allocation5 + $0x1], 1 }
 0x285   :  { %1417 = vsyncpa [#allocation6], 1 }
 0x286   :  { %1419 = vsyncpa [#allocation6 + $0x1], 1 }

</bundles_post_ra>
